<compile_context>
chip_gen: v6e
topology: v6e:2x2x1
jax: 0.10.0
libtpu: 0.0.40
codegen_flags: <defaults>
</compile_context>

<pallas_src>
import functools

import jax
import jax.numpy as jnp
from jax.experimental import pallas as pl
from jax.experimental.pallas import tpu as pltpu


def _round_up(x, m):
    return ((x + m - 1) // m) * m


def _tpu_vmem_capacity_bytes():
    """Best-effort per-core VMEM capacity query (safe fallback if unavailable)."""
    try:
        return int(pltpu.get_tpu_info().vmem_capacity_bytes)
    except Exception:
        return 64 * 1024 * 1024  # conservative: v7x-sized; safe on all parts


def _choose_tiling(n_rows, n_e, e_dim, itemsize):
    """Generation-aware row-tile size + VMEM limit.

    Working set per row (bytes): ~6 live (n_e,)-wide f32 temporaries
    (d, iota, select, one-hot, ...) + a few (e_dim,)-wide f32 temporaries +
    double-buffered z in / z_q out + the idx column.  The grid-invariant
    codebook (+ ||e||^2) is resident (double-buffered by BlockSpec).
    """
    vmem_cap = _tpu_vmem_capacity_bytes()
    small_vmem = vmem_cap <= 64 * 1024 * 1024            # v7x: 64 MiB / TensorCore
    vmem_limit = (40 if small_vmem else 64) * 1024 * 1024
    vmem_limit = min(vmem_limit, vmem_cap)
    max_tm = 1024 if small_vmem else 2048

    per_row = 4 * (6 * n_e + 6 * e_dim) + 2 * itemsize * (2 * e_dim) + 8
    codebook = 2 * (n_e * e_dim * 4 + n_e * 4)           # double-buffered
    avail = max(int(vmem_limit * 0.6) - codebook, 1 << 20)
    tm = max(128, min(max_tm, (avail // per_row) // 128 * 128))
    tm = min(tm, _round_up(n_rows, 128))

    # Prefer >= 2 tiles with an EVEN count (v7x shards the parallel grid axis
    # across 2 TensorCores); among nearby candidates pick the least padding.
    if n_rows > 128:
        cands = list(range(tm, max(127, tm // 2 - 1), -128))
        even = [t for t in cands if (_round_up(n_rows, t) // t) % 2 == 0]
        if even:
            tm = min(even, key=lambda t: (_round_up(n_rows, t) - n_rows, -t))
    return int(tm), int(vmem_limit)


def _vq_kernel(z_ref, neg2e_ref, esq_ref, zq_ref, idx_ref, hist_ref, loss_ref,
               *, valid_rows_last, mask_tail, distance_dtype, recon_dtype):
    """One row tile: distances -> argmin -> one-hot -> z_q (+ fused stats)."""
    tm = z_ref.shape[0]
    z = z_ref[...]                                    # (tm, e_dim)
    neg2e = neg2e_ref[...]                            # (n_e, e_dim) = -2 * E
    e_sq = esq_ref[...]                               # (1, n_e) f32
    n_e = neg2e.shape[0]

    # Distances in (rows, codes) orientation: d = ||e||^2 - 2 z.e  (||z||^2 is
    # constant per row -> cannot change the argmin -> dropped).  The -2 is
    # pre-folded into neg2e in the wrapper (grid-invariant), so there is no
    # per-tile VPU scale over the (tm, n_e) block.
    d = e_sq + jax.lax.dot_general(
        z.astype(distance_dtype), neg2e.astype(distance_dtype),
        (((1,), (1,)), ((), ())), preferred_element_type=jnp.float32)   # (tm, n_e)

    lane = jax.lax.broadcasted_iota(jnp.int32, d.shape, 1).astype(jnp.float32)
    min_d = jnp.min(d, axis=1, keepdims=True)                           # (tm, 1)
    # First-occurrence argmin (same tie-break as torch.argmin); f32 min is used
    # (indices are exactly representable).
    idx = jnp.min(jnp.where(d <= min_d, lane, float(n_e)),
                  axis=1, keepdims=True)                                # (tm, 1)

    onehot = (lane == idx).astype(jnp.float32)                          # (tm, n_e)
    # z_q = onehot @ E: plain A@B on the MXU (no one-hot transpose).  Since the
    # codebook is passed pre-scaled (-2E), rescale the SMALL (tm, e_dim) result
    # instead; one row is selected, so z_q == embedding[idx] bit-exactly
    # (scaling by powers of two is exact).
    zq = -0.5 * jax.lax.dot_general(
        onehot.astype(recon_dtype), neg2e.astype(recon_dtype),
        (((1,), (0,)), ((), ())), preferred_element_type=jnp.float32)   # (tm, e_dim)

    zq_ref[...] = zq.astype(zq_ref.dtype)
    idx_ref[...] = idx.astype(jnp.int32)

    diff = zq - z.astype(jnp.float32)
    sq = diff * diff                                                    # (tm, e_dim)

    def _write_stats(oh, sq_rows):
        # Lane-dense (1, n_e) histogram row via a cheap sublane sum.
        hist_ref[0] = jnp.sum(oh, axis=0, keepdims=True)
        loss_ref[0] = jnp.sum(jnp.sum(sq_rows, axis=1, keepdims=True),
                              axis=0, keepdims=True)                    # (1, 1)

    if not mask_tail:
        _write_stats(onehot, sq)
    else:
        # Only the last tile has padded rows; every other tile runs unmasked.
        is_last = pl.program_id(0) == pl.num_programs(0) - 1

        @pl.when(jnp.logical_not(is_last))
        def _():
            _write_stats(onehot, sq)

        @pl.when(is_last)
        def _():
            rows = jax.lax.broadcasted_iota(jnp.int32, (tm, 1), 0)
            valid = rows < valid_rows_last
            _write_stats(jnp.where(valid, onehot, 0.0),
                         jnp.where(valid, sq, 0.0))


def vector_quantizer_forward(z_nchw, embedding, beta, *, tm=None,
                             distance_dtype=None, recon_dtype=None):
    """Reproduces VectorQuantizer.forward (forward values).

    Returns (loss, z_q (NCHW), perplexity, min_encodings (N, n_e),
    min_encoding_indices (N, 1)).

    distance_dtype / recon_dtype: optionally run the distance / reconstruction
    matmuls in bf16 (large MXU win on v5e/v6e/v7x where f32 matmul is
    multi-pass).  Defaults keep the input/codebook dtype (f32 here) so indices
    and z_q match the f32 reference exactly; enable bf16 only after validating
    that near-tie argmin flips are acceptable for your codebook.
    """
    B, C, H, W = z_nchw.shape
    n_e, e_dim = embedding.shape
    assert C == e_dim

    distance_dtype = z_nchw.dtype if distance_dtype is None else distance_dtype
    recon_dtype = embedding.dtype if recon_dtype is None else recon_dtype

    # TODO(synk): if the surrounding model keeps activations NHWC, these two
    # transposes (a full extra HBM read+write of z and z_q each) go away.
    z_nhwc = jnp.transpose(z_nchw, (0, 2, 3, 1))
    z_flat = z_nhwc.reshape(-1, e_dim)
    N = z_flat.shape[0]

    itemsize = jnp.dtype(z_flat.dtype).itemsize
    auto_tm, vmem_limit = _choose_tiling(N, n_e, e_dim, itemsize)
    if tm is None:
        tm = auto_tm
    n_pad = _round_up(N, tm)
    if n_pad != N:
        z_flat = jnp.pad(z_flat, ((0, n_pad - N), (0, 0)))
    num_tiles = n_pad // tm
    mask_tail = (n_pad != N)
    valid_rows_last = N - (num_tiles - 1) * tm

    # Grid-invariant, pre-scaled codebook (-2E) and per-code norms (hoisted out
    # of the per-tile body; reused by every tile).
    emb_f32 = embedding.astype(jnp.float32)
    neg2e = -2.0 * embedding
    e_sq = jnp.sum(emb_f32 * emb_f32, axis=1)[None, :]        # (1, n_e) f32, lane-dense

    kernel = functools.partial(
        _vq_kernel,
        valid_rows_last=valid_rows_last,
        mask_tail=mask_tail,
        distance_dtype=distance_dtype,
        recon_dtype=recon_dtype,
    )

    zq_flat, idx_col, hist_tiles, loss_tiles = pl.pallas_call(
        kernel,
        out_shape=(
            jax.ShapeDtypeStruct((n_pad, e_dim), z_flat.dtype),
            jax.ShapeDtypeStruct((n_pad, 1), jnp.int32),
            jax.ShapeDtypeStruct((num_tiles, 1, n_e), jnp.float32),  # lane-dense hist
            jax.ShapeDtypeStruct((num_tiles, 1, 1), jnp.float32),    # per-tile sq-err
        ),
        grid_spec=pltpu.PrefetchScalarGridSpec(
            num_scalar_prefetch=0,
            grid=(num_tiles,),
            in_specs=[
                pl.BlockSpec((tm, e_dim), lambda i: (i, 0)),
                # Grid-invariant codebook + norms, resident every step.
                # TODO(synk): on v7x with very large codebooks, avoid
                # double-buffering these (pipeline_mode=pl.Buffered(1)) or chunk
                # n_e over a second grid axis.
                pl.BlockSpec((n_e, e_dim), lambda i: (0, 0)),
                pl.BlockSpec((1, n_e), lambda i: (0, 0)),
            ],
            out_specs=[
                pl.BlockSpec((tm, e_dim), lambda i: (i, 0)),
                pl.BlockSpec((tm, 1), lambda i: (i, 0)),
                pl.BlockSpec((1, 1, n_e), lambda i: (i, 0, 0)),
                pl.BlockSpec((1, 1, 1), lambda i: (i, 0, 0)),
            ],
        ),
        compiler_params=pltpu.CompilerParams(
            dimension_semantics=("parallel",),    # keep 2-TC sharding on v7x
            vmem_limit_bytes=vmem_limit,          # generation-aware (40 MiB on v7x)
        ),
    )(z_flat, neg2e, e_sq)

    zq_flat = zq_flat[:N]
    min_encoding_indices = idx_col[:N]                       # (N, 1) int32
    idx_flat = min_encoding_indices[:, 0]

    # Dense one-hot built only because the module returns it; callers that do
    # not consume min_encodings should skip this (idx/hist already cover it).
    min_encodings = jax.nn.one_hot(idx_flat, n_e, dtype=jnp.float32)

    # Perplexity from fused per-tile histograms (no re-read of the one-hot).
    e_mean = jnp.sum(hist_tiles, axis=(0, 1)) / N
    perplexity = jnp.exp(-jnp.sum(e_mean * jnp.log(e_mean + 1e-10)))

    # Forward value of mean((zq.detach()-z)^2) + beta*mean((zq-z.detach())^2).
    diff_sq_mean = jnp.sum(loss_tiles) / (N * e_dim)
    loss = (1.0 + beta) * diff_sq_mean

    # Straight-through estimator: forward value of z + (z_q - z).detach() is z_q.
    # TODO(synk): gradient (custom VJP / detach) semantics are not implemented;
    # this path is forward-only.
    z_q_nhwc = zq_flat.reshape(B, H, W, C)
    z_q = jnp.transpose(z_q_nhwc, (0, 3, 1, 2))              # back to NCHW
    return loss, z_q, perplexity, min_encodings, min_encoding_indices


def _reference_forward(z_nchw, embedding, beta):
    """Plain-JAX reference for a correctness sanity check."""
    B, C, H, W = z_nchw.shape
    z = jnp.transpose(z_nchw, (0, 2, 3, 1))
    zf = z.reshape(-1, C)
    d = (jnp.sum(zf**2, axis=1, keepdims=True)
         + jnp.sum(embedding**2, axis=1)
         - 2.0 * zf @ embedding.T)
    idx = jnp.argmin(d, axis=1)
    enc = jax.nn.one_hot(idx, embedding.shape[0], dtype=jnp.float32)
    zq = (enc @ embedding).reshape(z.shape)
    loss = jnp.mean((zq - z) ** 2) + beta * jnp.mean((zq - z) ** 2)
    e_mean = jnp.mean(enc, axis=0)
    perp = jnp.exp(-jnp.sum(e_mean * jnp.log(e_mean + 1e-10)))
    return loss, jnp.transpose(zq, (0, 3, 1, 2)), perp, enc, idx[:, None]


if __name__ == "__main__":
    # Module hyper-params (small, consistent with the forward pass).
    n_e, e_dim, beta = 16, 4, 0.25

    def run_case(B, H, W, seed):
        key = jax.random.PRNGKey(seed)
        kz, ke = jax.random.split(key)
        z = jax.random.normal(kz, (B, e_dim, H, W), dtype=jnp.float32)
        # nn.Embedding(n_e, e_dim) with weight.data.uniform_(-1/n_e, 1/n_e):
        embedding = jax.random.uniform(ke, (n_e, e_dim), dtype=jnp.float32,
                                       minval=-1.0 / n_e, maxval=1.0 / n_e)

        fwd = jax.jit(functools.partial(vector_quantizer_forward, beta=beta))
        out = fwd(z, embedding)
        jax.block_until_ready(out)
        loss, z_q, perplexity, min_encodings, min_encoding_indices = out

        r_loss, r_zq, r_perp, r_enc, r_idx = _reference_forward(z, embedding, beta)
        assert jnp.allclose(loss, r_loss, atol=1e-5)
        assert jnp.allclose(z_q, r_zq, atol=1e-5)
        assert jnp.allclose(perplexity, r_perp, atol=1e-4)
        assert jnp.array_equal(min_encodings, r_enc)
        assert jnp.array_equal(min_encoding_indices.astype(jnp.int32),
                               r_idx.astype(jnp.int32))

    # Primary case (no tail padding, 2 tiles) + a case that exercises the
    # pl.when last-tile masking path (N not a multiple of the row tile).
    run_case(2, 16, 16, seed=0)   # N = 512
    run_case(2, 18, 18, seed=1)   # N = 648 -> padded last tile

    print("KERNEL_OK")
</pallas_src>

<mosaic_0001>
module attributes {stable_mosaic.version = 11 : i64} {
  func.func @_vq_kernel(%arg0: i32, %arg1: memref<256x4xf32, #tpu.memory_space<vmem>>, %arg2: memref<16x4xf32, #tpu.memory_space<vmem>>, %arg3: memref<1x16xf32, #tpu.memory_space<vmem>>, %arg4: memref<256x4xf32, #tpu.memory_space<vmem>>, %arg5: memref<256x1xi32, #tpu.memory_space<vmem>>, %arg6: memref<1x1x16xf32, #tpu.memory_space<vmem>>, %arg7: memref<1x1x1xf32, #tpu.memory_space<vmem>>) attributes {dimension_semantics = [#tpu.dimension_semantics<parallel>], iteration_bounds = array<i64: 2>, scalar_prefetch = 0 : i64, scratch_operands = 0 : i64, tpu.core_type = #tpu.core_type<tc>, window_params = [{transform_indices = @transform_0, window_bounds = array<i64: 256, 4>}, {pipeline_mode = #tpu.pipeline_mode<synchronous>, transform_indices = @transform_1, window_bounds = array<i64: 16, 4>}, {pipeline_mode = #tpu.pipeline_mode<synchronous>, transform_indices = @transform_2, window_bounds = array<i64: 1, 16>}, {transform_indices = @transform_3, window_bounds = array<i64: 256, 4>}, {transform_indices = @transform_4, window_bounds = array<i64: 256, 1>}, {transform_indices = @transform_5, window_bounds = array<i64: 1, 1, 16>}, {transform_indices = @transform_6, window_bounds = array<i64: 1, 1, 1>}]} {
    %c0 = arith.constant 0 : index
    %c0_0 = arith.constant 0 : index
    %0 = vector.load %arg1[%c0, %c0_0] : memref<256x4xf32, #tpu.memory_space<vmem>>, vector<256x4xf32>
    %c0_1 = arith.constant 0 : index
    %c0_2 = arith.constant 0 : index
    %1 = vector.load %arg2[%c0_1, %c0_2] : memref<16x4xf32, #tpu.memory_space<vmem>>, vector<16x4xf32>
    %c0_3 = arith.constant 0 : index
    %c0_4 = arith.constant 0 : index
    %2 = vector.load %arg3[%c0_3, %c0_4] : memref<1x16xf32, #tpu.memory_space<vmem>>, vector<1x16xf32>
    %cst = arith.constant dense<0.000000e+00> : vector<256x16xf32>
    %3 = tpu.matmul %0, %1, %cst {dimension_numbers = #tpu.dot_dimension_numbers<[1], [1], [0], [0], [0, 0, 1, 0], [], []>} : vector<256x4xf32>, vector<16x4xf32>, vector<256x16xf32> -> vector<256x16xf32>
    %4 = vector.broadcast %2 : vector<1x16xf32> to vector<256x16xf32>
    %5 = arith.addf %4, %3 : vector<256x16xf32>
    %6 = tpu.iota {dimensions = array<i32: 1>} : vector<256x16xi32>
    %7 = arith.sitofp %6 : vector<256x16xi32> to vector<256x16xf32>
    %cst_5 = arith.constant dense<0x7F800000> : vector<256xf32>
    %8 = vector.multi_reduction <minimumf>, %5, %cst_5 [1] : vector<256x16xf32> to vector<256xf32>
    %9 = vector.shape_cast %8 : vector<256xf32> to vector<256x1xf32>
    %10 = vector.broadcast %9 : vector<256x1xf32> to vector<256x16xf32>
    %11 = arith.cmpf ole, %5, %10 : vector<256x16xf32>
    %cst_6 = arith.constant 1.600000e+01 : f32
    %12 = vector.broadcast %cst_6 : f32 to vector<256x16xf32>
    %13 = arith.select %11, %7, %12 : vector<256x16xi1>, vector<256x16xf32>
    %cst_7 = arith.constant dense<0x7F800000> : vector<256xf32>
    %14 = vector.multi_reduction <minimumf>, %13, %cst_7 [1] : vector<256x16xf32> to vector<256xf32>
    %15 = vector.shape_cast %14 : vector<256xf32> to vector<256x1xf32>
    %16 = vector.broadcast %15 : vector<256x1xf32> to vector<256x16xf32>
    %17 = arith.cmpf oeq, %7, %16 : vector<256x16xf32>
    %18 = arith.extui %17 : vector<256x16xi1> to vector<256x16xi32>
    %19 = arith.sitofp %18 : vector<256x16xi32> to vector<256x16xf32>
    %cst_8 = arith.constant dense<0.000000e+00> : vector<256x4xf32>
    %20 = tpu.matmul %19, %1, %cst_8 {dimension_numbers = #tpu.dot_dimension_numbers<[1], [0], [0], [1], [0, 0, 1, 1], [], []>} : vector<256x16xf32>, vector<16x4xf32>, vector<256x4xf32> -> vector<256x4xf32>
    %cst_9 = arith.constant -5.000000e-01 : f32
    %21 = vector.broadcast %cst_9 : f32 to vector<256x4xf32>
    %22 = arith.mulf %21, %20 : vector<256x4xf32>
    %c0_10 = arith.constant 0 : index
    %c0_11 = arith.constant 0 : index
    %23 = vector.load %arg4[%c0_10, %c0_11] : memref<256x4xf32, #tpu.memory_space<vmem>>, vector<256x4xf32>
    tpu.vector_store %arg4[%c0_10, %c0_11], %22 {strides = array<i32>} : memref<256x4xf32, #tpu.memory_space<vmem>>, vector<256x4xf32>,
    %24 = arith.fptosi %15 : vector<256x1xf32> to vector<256x1xi32>
    %c0_12 = arith.constant 0 : index
    %c0_13 = arith.constant 0 : index
    %25 = vector.load %arg5[%c0_12, %c0_13] : memref<256x1xi32, #tpu.memory_space<vmem>>, vector<256x1xi32>
    tpu.vector_store %arg5[%c0_12, %c0_13], %24 {strides = array<i32>} : memref<256x1xi32, #tpu.memory_space<vmem>>, vector<256x1xi32>,
    %26 = arith.subf %22, %0 : vector<256x4xf32>
    %27 = arith.mulf %26, %26 : vector<256x4xf32>
    %cst_14 = arith.constant dense<0.000000e+00> : vector<16xf32>
    %28 = vector.multi_reduction <add>, %19, %cst_14 [0] : vector<256x16xf32> to vector<16xf32>
    %29 = vector.shape_cast %28 : vector<16xf32> to vector<1x16xf32>
    %c0_15 = arith.constant 0 : index
    %c0_16 = arith.constant 0 : index
    %c0_17 = arith.constant 0 : index
    %30 = vector.load %arg6[%c0_15, %c0_16, %c0_17] : memref<1x1x16xf32, #tpu.memory_space<vmem>>, vector<1x1x16xf32>
    %31 = vector.shape_cast %30 : vector<1x1x16xf32> to vector<1x16xf32>
    %32 = vector.shape_cast %29 : vector<1x16xf32> to vector<1x1x16xf32>
    tpu.vector_store %arg6[%c0_15, %c0_16, %c0_17], %32 {strides = array<i32>} : memref<1x1x16xf32, #tpu.memory_space<vmem>>, vector<1x1x16xf32>,
    %cst_18 = arith.constant dense<0.000000e+00> : vector<256xf32>
    %33 = vector.multi_reduction <add>, %27, %cst_18 [1] : vector<256x4xf32> to vector<256xf32>
    %34 = vector.shape_cast %33 : vector<256xf32> to vector<256x1xf32>
    %cst_19 = arith.constant dense<0.000000e+00> : vector<1xf32>
    %35 = vector.multi_reduction <add>, %34, %cst_19 [0] : vector<256x1xf32> to vector<1xf32>
    %36 = vector.shape_cast %35 : vector<1xf32> to vector<1x1xf32>
    %c0_20 = arith.constant 0 : index
    %c0_21 = arith.constant 0 : index
    %c0_22 = arith.constant 0 : index
    %37 = vector.load %arg7[%c0_20, %c0_21, %c0_22] : memref<1x1x1xf32, #tpu.memory_space<vmem>>, vector<1x1x1xf32>
    %38 = vector.shape_cast %37 : vector<1x1x1xf32> to vector<1x1xf32>
    %39 = vector.shape_cast %36 : vector<1x1xf32> to vector<1x1x1xf32>
    tpu.vector_store %arg7[%c0_20, %c0_21, %c0_22], %39 {strides = array<i32>} : memref<1x1x1xf32, #tpu.memory_space<vmem>>, vector<1x1x1xf32>,
    return
  }
  func.func @transform_0(%arg0: i32) -> (i32, i32) {
    %c0_i32 = arith.constant 0 : i32
    %c0_i32_0 = arith.constant 0 : i32
    return %arg0, %c0_i32 : i32, i32
  }
  func.func @transform_1(%arg0: i32) -> (i32, i32) {
    %c0_i32 = arith.constant 0 : i32
    %c0_i32_0 = arith.constant 0 : i32
    %c0_i32_1 = arith.constant 0 : i32
    return %c0_i32, %c0_i32_0 : i32, i32
  }
  func.func @transform_2(%arg0: i32) -> (i32, i32) {
    %c0_i32 = arith.constant 0 : i32
    %c0_i32_0 = arith.constant 0 : i32
    %c0_i32_1 = arith.constant 0 : i32
    return %c0_i32, %c0_i32_0 : i32, i32
  }
  func.func @transform_3(%arg0: i32) -> (i32, i32) {
    %c0_i32 = arith.constant 0 : i32
    %c0_i32_0 = arith.constant 0 : i32
    return %arg0, %c0_i32 : i32, i32
  }
  func.func @transform_4(%arg0: i32) -> (i32, i32) {
    %c0_i32 = arith.constant 0 : i32
    %c0_i32_0 = arith.constant 0 : i32
    return %arg0, %c0_i32 : i32, i32
  }
  func.func @transform_5(%arg0: i32) -> (i32, i32, i32) {
    %c0_i32 = arith.constant 0 : i32
    %c0_i32_0 = arith.constant 0 : i32
    %c0_i32_1 = arith.constant 0 : i32
    return %arg0, %c0_i32, %c0_i32_0 : i32, i32, i32
  }
  func.func @transform_6(%arg0: i32) -> (i32, i32, i32) {
    %c0_i32 = arith.constant 0 : i32
    %c0_i32_0 = arith.constant 0 : i32
    %c0_i32_1 = arith.constant 0 : i32
    return %arg0, %c0_i32, %c0_i32_0 : i32, i32, i32
  }
}

</mosaic_0001>

<bundles_post_ra>
// kernel: vector_quantizer_forward.1
= control target key start
LH: loop header
LB: loop body
LE: loop exit
PB: predicated region body
PF: predicated region fallthrough
CT: control target
= control target key end

     0   :  { %s2335_s21 = smov 0   ;;  %s3038_s0 = inlined_call_operand.vmem [shape: f32[512,4], index: 0, kind: input, shape index: {}]   ;;  %s3039_s1 = inlined_call_operand.vmem [shape: f32[16,4], index: 1, kind: input, shape index: {}]   ;;  %s3040_s2 = inlined_call_operand.vmem [shape: f32[1,16], index: 2, kind: input, shape index: {}]   ;;  %s3041_s3 = inlined_call_operand.vmem [shape: f32[512,4], index: 3, kind: output, shape index: {0}]   ;;  %s3042_s4 = inlined_call_operand.vmem [shape: s32[512,1], index: 4, kind: output, shape index: {1}]   ;;  %s3043_s5 = inlined_call_operand.vmem [shape: f32[2,1,16], index: 5, kind: output, shape index: {2}]   ;;  %s3044_s6 = inlined_call_operand.vmem [shape: f32[2,1,1], index: 6, kind: output, shape index: {3}]  }
   0x1 LB: > { %s2341_s22 = sadd.s32 4294967295, %s2297_s21   ;;  %p1906_p0 = scmp.ge.s32.totalorder %s2297_s21, 1  ;;  %s2297_s21 = sphi %s2335_s21, %s17_s21  }
   0x2   : > { %p220_p1 = scmp.lt.s32.totalorder %s2297_s21, 3 }
   0x4   : > { %p221_p2 = pnand %p1906_p0, %p220_p1 }
   0x5   : > { %s1907_s27 = sshll.u32 (!%p221_p2), %s2341_s22, 5  ;;  %p279_p4 = scmp.lt.s32.totalorder (!%p221_p2), %s2341_s22, 1 }
   0x6   : > { %224 = sbr.rel (%p221_p2) target bundleno = 920 (0x398), region = 32  ;;  %p262_p3 = scmp.lt.s32.totalorder (!%p221_p2), %s1907_s27, 63 }
   0xb   : > { %v318_v0 = vld [vmem:[%s3039_s1 + $0x8] sm:$0xff]  ;;  %vm320_vm0 = vcmask 31744   ;;  %v317_v1 = vld [vmem:[%s3039_s1] sm:$0xff]  ;;  %s3046_s27 = smov (!%p262_p3, %s1907_s27), 63  ;;  %vm689_vm1 = vcmask 130048   ;;  %s3048_s22 = smov (!%p279_p4, %s2341_s22), 1 }
   0xc   : > { %2082 = vmatprep.subr.msk.mxu0 %vm320_vm0, %v318_v0  ;;  %2134 = vmatprep.subr.mxu1 %v318_v0  ;;  %s2355_s28 = sshll.u32 %s3046_s27, 3  ;;  %v2431_v35 = vld [vmem:[%s3040_s2] ss:$0 sm:$0xff]  ;;  %s281_s15 = scalar_lea.vmem %s3043_s5, %s3048_s22 }
   0xd   : > { %2083 = vmatpush3.xpose.msk.msra.mxu0 %vm320_vm0, %v318_v0  ;;  %2135 = vmatpush3.msra.mxu1 %v318_v0  ;;  %s2362_s7 = scalar_lea.vmem %s3038_s0, %s2355_s28  ;;  %s2696_s12 = scalar_lea.vmem %s3042_s4, %s2355_s28 }
   0xe   : > { %2084 = vmatprep.subr.msk.mxu0 %vm320_vm0, %v317_v1  ;;  %2136 = vmatprep.subr.mxu1 %v317_v1  ;;  %v285_v2 = vld [vmem:[%s2362_s7] sm:$0xff]  ;;  %v286_v3 = vld [vmem:[%s2362_s7 + $0x8] sm:$0xff]  ;;  %v287_v4 = vld [vmem:[%s2362_s7 + $0x10] sm:$0xff]  ;;  %s2901_s18 = scalar_lea.vmem %s3041_s3, %s2355_s28  ;;  %s284_s23 = scalar_lea.vmem %s3044_s6, %s3048_s22 }
   0xf   : > { %2137 = vmatpush3.msra.mxu1 %v317_v1  ;;  %2086 = vmatprep.mubr.msk.f32.mxu0 %vm320_vm0, %v285_v2  ;;  %v288_v5 = vld [vmem:[%s2362_s7 + $0x18] sm:$0xff]  ;;  %v289_v6 = vld [vmem:[%s2362_s7 + $0x20] sm:$0xff]  ;;  %v290_v7 = vld [vmem:[%s2362_s7 + $0x28] sm:$0xff] }
  0x10   : > { %v291_v8 = vld [vmem:[%s2362_s7 + $0x30] sm:$0xff]  ;;  %v292_v9 = vld [vmem:[%s2362_s7 + $0x38] sm:$0xff]  ;;  %v293_v10 = vld [vmem:[%s2362_s7 + $0x40] sm:$0xff] }
  0x11   : > { %2085 = vmatpush3.xpose.msk.msra.mxu0 %vm320_vm0, %v317_v1  ;;  %v294_v11 = vld [vmem:[%s2362_s7 + $0x48] sm:$0xff]  ;;  %v295_v12 = vld [vmem:[%s2362_s7 + $0x50] sm:$0xff]  ;;  %v296_v13 = vld [vmem:[%s2362_s7 + $0x58] sm:$0xff] }
  0x12   : > { %v297_v14 = vld [vmem:[%s2362_s7 + $0x60] sm:$0xff]  ;;  %v298_v15 = vld [vmem:[%s2362_s7 + $0x68] sm:$0xff]  ;;  %v299_v16 = vld [vmem:[%s2362_s7 + $0x70] sm:$0xff] }
  0x13   : > { %v300_v17 = vld [vmem:[%s2362_s7 + $0x78] sm:$0xff]  ;;  %v301_v18 = vld [vmem:[%s2362_s7 + $0x80] sm:$0xff]  ;;  %v302_v19 = vld [vmem:[%s2362_s7 + $0x88] sm:$0xff] }
  0x14   : > { %2087 = vmatmul.mubr.msk.f32.vlgmr.msra.gmra.mxu0 %vm320_vm0, %v286_v3  ;;  %v303_v20 = vld [vmem:[%s2362_s7 + $0x90] sm:$0xff]  ;;  %v304_v21 = vld [vmem:[%s2362_s7 + $0x98] sm:$0xff]  ;;  %v305_v22 = vld [vmem:[%s2362_s7 + $0xa0] sm:$0xff] }
  0x15   : > { %2089 = vmatprep.mubr.msk.f32.mxu0 %vm320_vm0, %v287_v4  ;;  %v306_v23 = vld [vmem:[%s2362_s7 + $0xa8] sm:$0xff]  ;;  %v307_v24 = vld [vmem:[%s2362_s7 + $0xb0] sm:$0xff]  ;;  %v308_v25 = vld [vmem:[%s2362_s7 + $0xb8] sm:$0xff] }
  0x16   : > { %v309_v26 = vld [vmem:[%s2362_s7 + $0xc0] sm:$0xff]  ;;  %v310_v27 = vld [vmem:[%s2362_s7 + $0xc8] sm:$0xff]  ;;  %v311_v28 = vld [vmem:[%s2362_s7 + $0xd0] sm:$0xff] }
  0x17   : > { %v312_v29 = vld [vmem:[%s2362_s7 + $0xd8] sm:$0xff]  ;;  %v313_v30 = vld [vmem:[%s2362_s7 + $0xe0] sm:$0xff]  ;;  %v314_v31 = vld [vmem:[%s2362_s7 + $0xe8] sm:$0xff] }
  0x18   : > { %2090 = vmatmul.mubr.msk.f32.gmra.mxu0 %vm320_vm0, %v288_v5  ;;  %v315_v32 = vld [vmem:[%s2362_s7 + $0xf0] sm:$0xff]  ;;  %v316_v33 = vld [vmem:[%s2362_s7 + $0xf8] sm:$0xff] }
  0x19   : > { %2092 = vmatprep.mubr.msk.f32.mxu0 %vm320_vm0, %v289_v6 }
  0x1c   : > { %2093 = vmatmul.mubr.msk.f32.gmra.mxu0 %vm320_vm0, %v290_v7 }
  0x1d   : > { %2095 = vmatprep.mubr.msk.f32.mxu0 %vm320_vm0, %v291_v8 }
  0x20   : > { %2096 = vmatmul.mubr.msk.f32.gmra.mxu0 %vm320_vm0, %v292_v9 }
  0x21   : > { %2098 = vmatprep.mubr.msk.f32.mxu0 %vm320_vm0, %v293_v10 }
  0x24   : > { %2099 = vmatmul.mubr.msk.f32.gmra.mxu0 %vm320_vm0, %v294_v11 }
  0x25   : > { %2101 = vmatprep.mubr.msk.f32.mxu0 %vm320_vm0, %v295_v12 }
  0x28   : > { %2102 = vmatmul.mubr.msk.f32.gmra.mxu0 %vm320_vm0, %v296_v13 }
  0x29   : > { %2104 = vmatprep.mubr.msk.f32.mxu0 %vm320_vm0, %v297_v14 }
  0x2c   : > { %2105 = vmatmul.mubr.msk.f32.gmra.mxu0 %vm320_vm0, %v298_v15 }
  0x2d   : > { %2107 = vmatprep.mubr.msk.f32.mxu0 %vm320_vm0, %v299_v16 }
  0x30   : > { %2108 = vmatmul.mubr.msk.f32.gmra.mxu0 %vm320_vm0, %v300_v17 }
  0x31   : > { %2110 = vmatprep.mubr.msk.f32.mxu0 %vm320_vm0, %v301_v18 }
  0x34   : > { %2111 = vmatmul.mubr.msk.f32.gmra.mxu0 %vm320_vm0, %v302_v19 }
  0x35   : > { %2113 = vmatprep.mubr.msk.f32.mxu0 %vm320_vm0, %v303_v20 }
  0x38   : > { %2114 = vmatmul.mubr.msk.f32.gmra.mxu0 %vm320_vm0, %v304_v21 }
  0x39   : > { %2116 = vmatprep.mubr.msk.f32.mxu0 %vm320_vm0, %v305_v22 }
  0x3c   : > { %2117 = vmatmul.mubr.msk.f32.gmra.mxu0 %vm320_vm0, %v306_v23 }
  0x3d   : > { %2119 = vmatprep.mubr.msk.f32.mxu0 %vm320_vm0, %v307_v24 }
  0x40   : > { %2120 = vmatmul.mubr.msk.f32.gmra.mxu0 %vm320_vm0, %v308_v25 }
  0x41   : > { %2122 = vmatprep.mubr.msk.f32.mxu0 %vm320_vm0, %v309_v26 }
  0x44   : > { %2123 = vmatmul.mubr.msk.f32.gmra.mxu0 %vm320_vm0, %v310_v27 }
  0x45   : > { %2125 = vmatprep.mubr.msk.f32.mxu0 %vm320_vm0, %v311_v28 }
  0x48   : > { %2126 = vmatmul.mubr.msk.f32.gmra.mxu0 %vm320_vm0, %v312_v29 }
  0x49   : > { %2128 = vmatprep.mubr.msk.f32.mxu0 %vm320_vm0, %v313_v30 }
  0x4c   : > { %2129 = vmatmul.mubr.msk.f32.gmra.mxu0 %vm320_vm0, %v314_v31 }
  0x4d   : > { %2131 = vmatprep.mubr.msk.f32.mxu0 %vm320_vm0, %v315_v32 }
  0x50   : > { %2132 = vmatmul.mubr.msk.f32.gmra.mxu0 %vm320_vm0, %v316_v33 }
  0xd4   : > { %v2088_v34 = vpop.f32.mrf.mxu0 }
  0xd5   : > { %v2437_v39 = vadd.f32 %v2088_v34, %v2431_v35 }
  0xd6   : > { %v489_v36 = vpop.f32.mrf.mxu0 }
  0xd7   : > { %v2434_v37 = vadd.f32 %v2431_v35, %v489_v36  ;;  %v693_v45 = vsel %vm689_vm1, %v2437_v39, inf }
  0xd8   : > { %v2091_v38 = vpop.f32.mrf.mxu0 }
  0xd9   : > { %v690_v40 = vsel %vm689_vm1, %v2434_v37, inf  ;;  %v2445_v44 = vadd.f32 %v2091_v38, %v2431_v35 }
  0xda   : > { %691 = vmin.xlane.f32.xlu0 %v690_v40  ;;  %v499_v41 = vpop.f32.mrf.mxu0 }
  0xdb   : > { %v2442_v42 = vadd.f32 %v2431_v35, %v499_v41  ;;  %v699_v51 = vsel %vm689_vm1, %v2445_v44, inf }
  0xdc   : > { %v2094_v43 = vpop.f32.mrf.mxu0 }
  0xdd   : > { %v696_v46 = vsel %vm689_vm1, %v2442_v42, inf  ;;  %v2455_v50 = vadd.f32 %v2094_v43, %v2431_v35 }
  0xde   : > { %694 = vmin.xlane.f32.xlu0 %v693_v45  ;;  %697 = vmin.xlane.f32.xlu1 %v696_v46  ;;  %v509_v47 = vpop.f32.mrf.mxu0 }
  0xdf   : > { %v2452_v48 = vadd.f32 %v2431_v35, %v509_v47  ;;  %v705_v57 = vsel %vm689_vm1, %v2455_v50, inf }
  0xe0   : > { %v2097_v49 = vpop.f32.mrf.mxu0 }
  0xe1   : > { %v702_v52 = vsel %vm689_vm1, %v2452_v48, inf  ;;  %v2465_v56 = vadd.f32 %v2097_v49, %v2431_v35 }
  0xe2   : > { %700 = vmin.xlane.f32.xlu1 %v699_v51  ;;  %703 = vmin.xlane.f32.xlu0 %v702_v52  ;;  %v519_v53 = vpop.f32.mrf.mxu0 }
  0xe3   : > { %v2462_v54 = vadd.f32 %v2431_v35, %v519_v53  ;;  %v711_v63 = vsel %vm689_vm1, %v2465_v56, inf }
  0xe4   : > { %v2100_v55 = vpop.f32.mrf.mxu0 }
  0xe5   : > { %v708_v58 = vsel %vm689_vm1, %v2462_v54, inf  ;;  %v2475_v62 = vadd.f32 %v2100_v55, %v2431_v35 }
  0xe6   : > { %706 = vmin.xlane.f32.xlu1 %v705_v57  ;;  %709 = vmin.xlane.f32.xlu0 %v708_v58  ;;  %v529_v59 = vpop.f32.mrf.mxu0 }
  0xe7   : > { %v2472_v60 = vadd.f32 %v2431_v35, %v529_v59  ;;  %v717_v5 = vsel %vm689_vm1, %v2475_v62, inf }
  0xe8   : > { %v2103_v61 = vpop.f32.mrf.mxu0 }
  0xe9   : > { %v714_v0 = vsel %vm689_vm1, %v2472_v60, inf  ;;  %v2485_v4 = vadd.f32 %v2103_v61, %v2431_v35 }
  0xea   : > { %712 = vmin.xlane.f32.xlu1 %v711_v63  ;;  %715 = vmin.xlane.f32.xlu0 %v714_v0  ;;  %v539_v1 = vpop.f32.mrf.mxu0 }
  0xeb   : > { %v2482_v2 = vadd.f32 %v2431_v35, %v539_v1  ;;  %v723_v11 = vsel %vm689_vm1, %v2485_v4, inf }
  0xec   : > { %v2106_v3 = vpop.f32.mrf.mxu0 }
  0xed   : > { %v720_v6 = vsel %vm689_vm1, %v2482_v2, inf  ;;  %v2495_v10 = vadd.f32 %v2106_v3, %v2431_v35 }
  0xee   : > { %718 = vmin.xlane.f32.xlu1 %v717_v5  ;;  %721 = vmin.xlane.f32.xlu0 %v720_v6  ;;  %v549_v7 = vpop.f32.mrf.mxu0 }
  0xef   : > { %v2492_v8 = vadd.f32 %v2431_v35, %v549_v7  ;;  %v729_v17 = vsel %vm689_vm1, %v2495_v10, inf }
  0xf0   : > { %v2109_v9 = vpop.f32.mrf.mxu0 }
  0xf1   : > { %v726_v12 = vsel %vm689_vm1, %v2492_v8, inf  ;;  %v2505_v16 = vadd.f32 %v2109_v9, %v2431_v35 }
  0xf2   : > { %724 = vmin.xlane.f32.xlu1 %v723_v11  ;;  %727 = vmin.xlane.f32.xlu0 %v726_v12  ;;  %v559_v13 = vpop.f32.mrf.mxu0 }
  0xf3   : > { %v2502_v14 = vadd.f32 %v2431_v35, %v559_v13  ;;  %v735_v23 = vsel %vm689_vm1, %v2505_v16, inf }
  0xf4   : > { %v2112_v15 = vpop.f32.mrf.mxu0 }
  0xf5   : > { %v732_v18 = vsel %vm689_vm1, %v2502_v14, inf  ;;  %v2515_v22 = vadd.f32 %v2112_v15, %v2431_v35 }
  0xf6   : > { %730 = vmin.xlane.f32.xlu1 %v729_v17  ;;  %733 = vmin.xlane.f32.xlu0 %v732_v18  ;;  %v569_v19 = vpop.f32.mrf.mxu0 }
  0xf7   : > { %v2512_v20 = vadd.f32 %v2431_v35, %v569_v19  ;;  %v741_v29 = vsel %vm689_vm1, %v2515_v22, inf }
  0xf8   : > { %v2115_v21 = vpop.f32.mrf.mxu0 }
  0xf9   : > { %v738_v24 = vsel %vm689_vm1, %v2512_v20, inf  ;;  %v2525_v28 = vadd.f32 %v2115_v21, %v2431_v35  ;;  %v686_v21 = vlaneseq }
  0xfa   : > { %736 = vmin.xlane.f32.xlu1 %v735_v23  ;;  %739 = vmin.xlane.f32.xlu0 %v738_v24  ;;  %v579_v25 = vpop.f32.mrf.mxu0 }
  0xfb   : > { %v2522_v26 = vadd.f32 %v2431_v35, %v579_v25  ;;  %v747_v36 = vsel %vm689_vm1, %v2525_v28, inf  ;;  %v687_v23 = vand.u32 127, %v686_v21 }
  0xfc   : > { %v2118_v27 = vpop.f32.mrf.mxu0 }
  0xfd   : > { %v744_v30 = vsel %vm689_vm1, %v2522_v26, inf  ;;  %v2535_v34 = vadd.f32 %v2118_v27, %v2431_v35  ;;  %v2593_v24 = vcvt.s32.f32 %v687_v23 }
  0xfe   : > { %742 = vmin.xlane.f32.xlu1 %v741_v29  ;;  %745 = vmin.xlane.f32.xlu0 %v744_v30  ;;  %v589_v31 = vpop.f32.mrf.mxu0 }
  0xff   : > { %v2532_v32 = vadd.f32 %v2431_v35, %v589_v31  ;;  %v753_v46 = vsel %vm689_vm1, %v2535_v34, inf }
 0x100   : > { %v2121_v33 = vpop.f32.mrf.mxu0 }
 0x101   : > { %v750_v38 = vsel %vm689_vm1, %v2532_v32, inf  ;;  %v2545_v45 = vadd.f32 %v2121_v33, %v2431_v35 }
 0x102   : > { %748 = vmin.xlane.f32.xlu1 %v747_v36  ;;  %751 = vmin.xlane.f32.xlu0 %v750_v38  ;;  %v599_v40 = vpop.f32.mrf.mxu0 }
 0x103   : > { %v2542_v41 = vadd.f32 %v2431_v35, %v599_v40  ;;  %v759_v55 = vsel %vm689_vm1, %v2545_v45, inf }
 0x104   : > { %v2124_v43 = vpop.f32.mrf.mxu0 }
 0x105   : > { %v756_v47 = vsel %vm689_vm1, %v2542_v41, inf  ;;  %v2555_v53 = vadd.f32 %v2124_v43, %v2431_v35 }
 0x106   : > { %754 = vmin.xlane.f32.xlu1 %v753_v46  ;;  %757 = vmin.xlane.f32.xlu0 %v756_v47  ;;  %v609_v49 = vpop.f32.mrf.mxu0 }
 0x107   : > { %v2552_v51 = vadd.f32 %v2431_v35, %v609_v49  ;;  %v765_v0 = vsel %vm689_vm1, %v2555_v53, inf }
 0x108   : > { %v2127_v52 = vpop.f32.mrf.mxu0 }
 0x109   : > { %v762_v57 = vsel %vm689_vm1, %v2552_v51, inf  ;;  %v2565_v63 = vadd.f32 %v2127_v52, %v2431_v35 }
 0x10a   : > { %760 = vmin.xlane.f32.xlu1 %v759_v55  ;;  %763 = vmin.xlane.f32.xlu0 %v762_v57  ;;  %v619_v58 = vpop.f32.mrf.mxu0 }
 0x10b   : > { %v2562_v59 = vadd.f32 %v2431_v35, %v619_v58  ;;  %v771_v9 = vsel %vm689_vm1, %v2565_v63, inf }
 0x10c   : > { %v2130_v61 = vpop.f32.mrf.mxu0 }
 0x10d   : > { %v768_v1 = vsel %vm689_vm1, %v2562_v59, inf  ;;  %v2575_v7 = vadd.f32 %v2130_v61, %v2431_v35 }
 0x10e   : > { %766 = vmin.xlane.f32.xlu1 %v765_v0  ;;  %769 = vmin.xlane.f32.xlu0 %v768_v1  ;;  %v629_v3 = vpop.f32.mrf.mxu0 }
 0x10f   : > { %v2572_v5 = vadd.f32 %v2431_v35, %v629_v3  ;;  %v777_v17 = vsel %vm689_vm1, %v2575_v7, inf }
 0x110   : > { %v2133_v6 = vpop.f32.mrf.mxu0 }
 0x111   : > { %v774_v11 = vsel %vm689_vm1, %v2572_v5, inf  ;;  %v2585_v15 = vadd.f32 %v2133_v6, %v2431_v35 }
 0x112   : > { %772 = vmin.xlane.f32.xlu1 %v771_v9  ;;  %775 = vmin.xlane.f32.xlu0 %v774_v11  ;;  %v639_v12 = vpop.f32.mrf.mxu0 }
 0x113   : > { %v2582_v13 = vadd.f32 %v2431_v35, %v639_v12  ;;  %v783_v19 = vsel %vm689_vm1, %v2585_v15, inf }
 0x115   : > { %v780_v18 = vsel %vm689_vm1, %v2582_v13, inf }
 0x116   : > { %778 = vmin.xlane.f32.xlu1 %v777_v17  ;;  %781 = vmin.xlane.f32.xlu0 %v780_v18 }
 0x11a   : > { %784 = vmin.xlane.f32.xlu1 %v783_v19 }
 0x163   : > { %v692_v25 = vpop.xlane.xlu0 %691 }
 0x164   : > { %vm786_vm2 = vcmp.le.f32.partialorder %v2434_v37, %v692_v25 }
 0x165   : > { %v818_v35 = vsel %vm786_vm2, %v2593_v24, 16.0 }
 0x166   : > { %v850_v27 = vsel %vm689_vm1, %v818_v35, inf }
 0x167   : > { %v695_v29 = vpop.xlane.xlu0 %694  ;;  %v698_v30 = vpop.xlane.xlu1 %697  ;;  %851 = vmin.xlane.f32.xlu0 %v850_v27 }
 0x168   : > { %vm787_vm3 = vcmp.le.f32.partialorder %v2437_v39, %v695_v29  ;;  %vm788_vm4 = vcmp.le.f32.partialorder %v2442_v42, %v698_v30 }
 0x169   : > { %v819_v31 = vsel %vm787_vm3, %v2593_v24, 16.0  ;;  %v820_v33 = vsel %vm788_vm4, %v2593_v24, 16.0 }
 0x16a   : > { %v853_v36 = vsel %vm689_vm1, %v819_v31, inf  ;;  %v856_v38 = vsel %vm689_vm1, %v820_v33, inf }
 0x16b   : > { %v701_v37 = vpop.xlane.xlu1 %700  ;;  %v704_v40 = vpop.xlane.xlu0 %703  ;;  %854 = vmin.xlane.f32.xlu1 %v853_v36  ;;  %857 = vmin.xlane.f32.xlu0 %v856_v38 }
 0x16c   : > { %vm789_vm5 = vcmp.le.f32.partialorder %v2445_v44, %v701_v37  ;;  %vm790_vm6 = vcmp.le.f32.partialorder %v2452_v48, %v704_v40 }
 0x16d   : > { %v821_v39 = vsel %vm789_vm5, %v2593_v24, 16.0  ;;  %v822_v42 = vsel %vm790_vm6, %v2593_v24, 16.0 }
 0x16e   : > { %v859_v43 = vsel %vm689_vm1, %v821_v39, inf  ;;  %v862_v46 = vsel %vm689_vm1, %v822_v42, inf }
 0x16f   : > { %v707_v47 = vpop.xlane.xlu1 %706  ;;  %v710_v49 = vpop.xlane.xlu0 %709  ;;  %860 = vmin.xlane.f32.xlu1 %v859_v43  ;;  %863 = vmin.xlane.f32.xlu0 %v862_v46 }
 0x170   : > { %vm791_vm7 = vcmp.le.f32.partialorder %v2455_v50, %v707_v47  ;;  %vm792_vm8 = vcmp.le.f32.partialorder %v2462_v54, %v710_v49 }
 0x171   : > { %v823_v44 = vsel %vm791_vm7, %v2593_v24, 16.0  ;;  %v824_v48 = vsel %vm792_vm8, %v2593_v24, 16.0 }
 0x172   : > { %v865_v52 = vsel %vm689_vm1, %v823_v44, inf  ;;  %v868_v55 = vsel %vm689_vm1, %v824_v48, inf }
 0x173   : > { %v713_v57 = vpop.xlane.xlu1 %712  ;;  %v716_v58 = vpop.xlane.xlu0 %715  ;;  %866 = vmin.xlane.f32.xlu1 %v865_v52  ;;  %869 = vmin.xlane.f32.xlu0 %v868_v55 }
 0x174   : > { %vm793_vm9 = vcmp.le.f32.partialorder %v2465_v56, %v713_v57  ;;  %vm794_vm10 = vcmp.le.f32.partialorder %v2472_v60, %v716_v58 }
 0x175   : > { %v825_v50 = vsel %vm793_vm9, %v2593_v24, 16.0  ;;  %v826_v54 = vsel %vm794_vm10, %v2593_v24, 16.0 }
 0x176   : > { %v871_v61 = vsel %vm689_vm1, %v825_v50, inf  ;;  %v874_v0 = vsel %vm689_vm1, %v826_v54, inf }
 0x177   : > { %v719_v1 = vpop.xlane.xlu1 %718  ;;  %v722_v3 = vpop.xlane.xlu0 %721  ;;  %872 = vmin.xlane.f32.xlu1 %v871_v61  ;;  %875 = vmin.xlane.f32.xlu0 %v874_v0 }
 0x178   : > { %vm795_vm11 = vcmp.le.f32.partialorder %v2475_v62, %v719_v1  ;;  %vm796_vm12 = vcmp.le.f32.partialorder %v2482_v2, %v722_v3 }
 0x179   : > { %v827_v56 = vsel %vm795_vm11, %v2593_v24, 16.0  ;;  %v828_v60 = vsel %vm796_vm12, %v2593_v24, 16.0 }
 0x17a   : > { %v877_v6 = vsel %vm689_vm1, %v827_v56, inf  ;;  %v880_v9 = vsel %vm689_vm1, %v828_v60, inf }
 0x17b   : > { %v725_v11 = vpop.xlane.xlu1 %724  ;;  %v728_v12 = vpop.xlane.xlu0 %727  ;;  %878 = vmin.xlane.f32.xlu1 %v877_v6  ;;  %881 = vmin.xlane.f32.xlu0 %v880_v9 }
 0x17c   : > { %vm797_vm13 = vcmp.le.f32.partialorder %v2485_v4, %v725_v11  ;;  %vm798_vm14 = vcmp.le.f32.partialorder %v2492_v8, %v728_v12 }
 0x17d   : > { %v829_v62 = vsel %vm797_vm13, %v2593_v24, 16.0  ;;  %v830_v2 = vsel %vm798_vm14, %v2593_v24, 16.0 }
 0x17e   : > { %v883_v17 = vsel %vm689_vm1, %v829_v62, inf  ;;  %v886_v18 = vsel %vm689_vm1, %v830_v2, inf  ;;  %v2299_v2 = vmov 0.0  }
 0x17f   : > { %v731_v19 = vpop.xlane.xlu1 %730  ;;  %v734_v21 = vpop.xlane.xlu0 %733  ;;  %884 = vmin.xlane.f32.xlu1 %v883_v17  ;;  %887 = vmin.xlane.f32.xlu0 %v886_v18 }
 0x180   : > { %vm799_vm15 = vcmp.le.f32.partialorder %v2495_v10, %v731_v19  ;;  %vm800_vm2 = vcmp.le.f32.partialorder %v2502_v14, %v734_v21 }
 0x181   : > { %v831_v4 = vsel %vm799_vm15, %v2593_v24, 16.0  ;;  %v832_v8 = vsel %vm800_vm2, %v2593_v24, 16.0 }
 0x182   : > { %v889_v23 = vsel %vm689_vm1, %v831_v4, inf  ;;  %v892_v25 = vsel %vm689_vm1, %v832_v8, inf }
 0x183   : > { %v737_v35 = vpop.xlane.xlu1 %736  ;;  %v740_v27 = vpop.xlane.xlu0 %739  ;;  %890 = vmin.xlane.f32.xlu1 %v889_v23  ;;  %893 = vmin.xlane.f32.xlu0 %v892_v25 }
 0x184   : > { %vm801_vm3 = vcmp.le.f32.partialorder %v2505_v16, %v737_v35  ;;  %vm802_vm4 = vcmp.le.f32.partialorder %v2512_v20, %v740_v27 }
 0x185   : > { %v833_v10 = vsel %vm801_vm3, %v2593_v24, 16.0  ;;  %v834_v14 = vsel %vm802_vm4, %v2593_v24, 16.0 }
 0x186   : > { %v895_v29 = vsel %vm689_vm1, %v833_v10, inf  ;;  %v898_v30 = vsel %vm689_vm1, %v834_v14, inf }
 0x187   : > { %v743_v31 = vpop.xlane.xlu1 %742  ;;  %v746_v33 = vpop.xlane.xlu0 %745  ;;  %896 = vmin.xlane.f32.xlu1 %v895_v29  ;;  %899 = vmin.xlane.f32.xlu0 %v898_v30 }
 0x188   : > { %vm803_vm5 = vcmp.le.f32.partialorder %v2515_v22, %v743_v31  ;;  %vm804_vm6 = vcmp.le.f32.partialorder %v2522_v26, %v746_v33 }
 0x189   : > { %v835_v16 = vsel %vm803_vm5, %v2593_v24, 16.0  ;;  %v836_v20 = vsel %vm804_vm6, %v2593_v24, 16.0 }
 0x18a   : > { %v901_v36 = vsel %vm689_vm1, %v835_v16, inf  ;;  %v904_v38 = vsel %vm689_vm1, %v836_v20, inf }
 0x18b   : > { %v749_v37 = vpop.xlane.xlu1 %748  ;;  %v752_v40 = vpop.xlane.xlu0 %751  ;;  %902 = vmin.xlane.f32.xlu1 %v901_v36  ;;  %905 = vmin.xlane.f32.xlu0 %v904_v38 }
 0x18c   : > { %vm805_vm7 = vcmp.le.f32.partialorder %v2525_v28, %v749_v37  ;;  %vm806_vm8 = vcmp.le.f32.partialorder %v2532_v32, %v752_v40 }
 0x18d   : > { %v837_v22 = vsel %vm805_vm7, %v2593_v24, 16.0  ;;  %v838_v26 = vsel %vm806_vm8, %v2593_v24, 16.0  ;;  %vm1459_vm7 = vcmask 7168  }
 0x18e   : > { %v907_v39 = vsel %vm689_vm1, %v837_v22, inf  ;;  %v910_v42 = vsel %vm689_vm1, %v838_v26, inf }
 0x18f   : > { %v755_v43 = vpop.xlane.xlu1 %754  ;;  %v758_v46 = vpop.xlane.xlu0 %757  ;;  %908 = vmin.xlane.f32.xlu1 %v907_v39  ;;  %911 = vmin.xlane.f32.xlu0 %v910_v42 }
 0x190   : > { %vm807_vm9 = vcmp.le.f32.partialorder %v2535_v34, %v755_v43  ;;  %vm808_vm10 = vcmp.le.f32.partialorder %v2542_v41, %v758_v46 }
 0x191   : > { %v839_v28 = vsel %vm807_vm9, %v2593_v24, 16.0  ;;  %v840_v32 = vsel %vm808_vm10, %v2593_v24, 16.0 }
 0x192   : > { %v913_v47 = vsel %vm689_vm1, %v839_v28, inf  ;;  %v916_v49 = vsel %vm689_vm1, %v840_v32, inf }
 0x193   : > { %v761_v44 = vpop.xlane.xlu1 %760  ;;  %v764_v48 = vpop.xlane.xlu0 %763  ;;  %914 = vmin.xlane.f32.xlu1 %v913_v47  ;;  %917 = vmin.xlane.f32.xlu0 %v916_v49 }
 0x194   : > { %vm809_vm11 = vcmp.le.f32.partialorder %v2545_v45, %v761_v44  ;;  %vm810_vm12 = vcmp.le.f32.partialorder %v2552_v51, %v764_v48 }
 0x195   : > { %v841_v34 = vsel %vm809_vm11, %v2593_v24, 16.0  ;;  %v842_v41 = vsel %vm810_vm12, %v2593_v24, 16.0 }
 0x196   : > { %v919_v52 = vsel %vm689_vm1, %v841_v34, inf  ;;  %v922_v55 = vsel %vm689_vm1, %v842_v41, inf }
 0x197   : > { %v767_v57 = vpop.xlane.xlu1 %766  ;;  %v770_v58 = vpop.xlane.xlu0 %769  ;;  %920 = vmin.xlane.f32.xlu1 %v919_v52  ;;  %923 = vmin.xlane.f32.xlu0 %v922_v55 }
 0x198   : > { %vm811_vm13 = vcmp.le.f32.partialorder %v2555_v53, %v767_v57  ;;  %vm812_vm14 = vcmp.le.f32.partialorder %v2562_v59, %v770_v58 }
 0x199   : > { %v843_v45 = vsel %vm811_vm13, %v2593_v24, 16.0  ;;  %v844_v51 = vsel %vm812_vm14, %v2593_v24, 16.0 }
 0x19a   : > { %v925_v50 = vsel %vm689_vm1, %v843_v45, inf  ;;  %v928_v54 = vsel %vm689_vm1, %v844_v51, inf }
 0x19b   : > { %v773_v61 = vpop.xlane.xlu1 %772  ;;  %v776_v0 = vpop.xlane.xlu0 %775  ;;  %926 = vmin.xlane.f32.xlu1 %v925_v50  ;;  %929 = vmin.xlane.f32.xlu0 %v928_v54 }
 0x19c   : > { %vm813_vm15 = vcmp.le.f32.partialorder %v2565_v63, %v773_v61  ;;  %vm814_vm2 = vcmp.le.f32.partialorder %v2572_v5, %v776_v0 }
 0x19d   : > { %v845_v53 = vsel %vm813_vm15, %v2593_v24, 16.0  ;;  %v846_v59 = vsel %vm814_vm2, %v2593_v24, 16.0 }
 0x19e   : > { %v931_v1 = vsel %vm689_vm1, %v845_v53, inf  ;;  %v934_v3 = vsel %vm689_vm1, %v846_v59, inf }
 0x19f   : > { %v779_v56 = vpop.xlane.xlu1 %778  ;;  %932 = vmin.xlane.f32.xlu1 %v931_v1  ;;  %935 = vmin.xlane.f32.xlu0 %v934_v3  ;;  %v782_v60 = vpop.xlane.xlu0 %781 }
 0x1a0   : > { %vm815_vm3 = vcmp.le.f32.partialorder %v2575_v7, %v779_v56  ;;  %vm816_vm4 = vcmp.le.f32.partialorder %v2582_v13, %v782_v60 }
 0x1a1   : > { %v847_v63 = vsel %vm815_vm3, %v2593_v24, 16.0  ;;  %v848_v5 = vsel %vm816_vm4, %v2593_v24, 16.0 }
 0x1a2   : > { %v937_v6 = vsel %vm689_vm1, %v847_v63, inf  ;;  %v940_v9 = vsel %vm689_vm1, %v848_v5, inf }
 0x1a3   : > { %938 = vmin.xlane.f32.xlu1 %v937_v6  ;;  %v785_v11 = vpop.xlane.xlu1 %784  ;;  %941 = vmin.xlane.f32.xlu0 %v940_v9 }
 0x1a4   : > { %vm817_vm5 = vcmp.le.f32.partialorder %v2585_v15, %v785_v11 }
 0x1a5   : > { %v849_v12 = vsel %vm817_vm5, %v2593_v24, 16.0 }
 0x1a6   : > { %v943_v7 = vsel %vm689_vm1, %v849_v12, inf }
 0x1a7   : > { %944 = vmin.xlane.f32.xlu1 %v943_v7 }
 0x1f0   : > { %v852_v62 = vpop.xlane.xlu0 %851 }
 0x1f1   : > { %v2186_v13 = vtrunc.f32 %v852_v62  ;;  %vm946_vm6 = vcmp.eq.f32.partialorder %v2593_v24, %v852_v62 }
 0x1f2   : > { %v1948_v17 = vsel %vm946_vm6, 1.0, %v2299_v2 }
 0x1f3   : > { %v2187_v15 = vcvt.f32.s32 %v2186_v13  ;;  %2138 = vmatprep.mubr.msk.f32.mxu1 %vm689_vm1, %v1948_v17  ;;  %v1556_v25 = vsel %vm689_vm1, %v1948_v17, 0.0 }
 0x1f4   : > { %v855_v18 = vpop.xlane.xlu1 %854  ;;  %v858_v19 = vpop.xlane.xlu0 %857 }
 0x1f5   : > { %1460 = vst.msk [vmem:[%s2696_s12] sm:$0xff] %vm1459_vm7, %v2187_v15  ;;  %vm947_vm8 = vcmp.eq.f32.partialorder %v2593_v24, %v855_v18  ;;  %v2188_v21 = vtrunc.f32 %v855_v18  ;;  %vm948_vm9 = vcmp.eq.f32.partialorder %v2593_v24, %v858_v19  ;;  %v2190_v4 = vtrunc.f32 %v858_v19 }
 0x1f6   : > { %v1949_v8 = vsel %vm947_vm8, 1.0, %v2299_v2  ;;  %v1950_v23 = vsel %vm948_vm9, 1.0, %v2299_v2 }
 0x1f7   : > { %v2189_v35 = vcvt.f32.s32 %v2188_v21  ;;  %v1557_v27 = vsel %vm689_vm1, %v1949_v8, 0.0  ;;  %v2191_v10 = vcvt.f32.s32 %v2190_v4  ;;  %2139 = vmatmul.mubr.msk.f32.vlgmr.msra.gmra.mxu1 %vm689_vm1, %v1949_v8  ;;  %v1559_v29 = vsel %vm689_vm1, %v1950_v23, 0.0 }
 0x1f8   : > { %v1558_v14 = vadd.f32 %v1557_v27, %v1556_v25  ;;  %v861_v30 = vpop.xlane.xlu1 %860  ;;  %2141 = vmatprep.mubr.msk.f32.mxu1 %vm689_vm1, %v1950_v23  ;;  %v864_v31 = vpop.xlane.xlu0 %863 }
 0x1f9   : > { %1461 = vst.msk [vmem:[%s2696_s12 + $0x8] sm:$0xff] %vm1459_vm7, %v2189_v35  ;;  %1462 = vst.msk [vmem:[%s2696_s12 + $0x10] sm:$0xff] %vm1459_vm7, %v2191_v10  ;;  %vm949_vm10 = vcmp.eq.f32.partialorder %v2593_v24, %v861_v30  ;;  %v2192_v33 = vtrunc.f32 %v861_v30  ;;  %vm950_vm11 = vcmp.eq.f32.partialorder %v2593_v24, %v864_v31  ;;  %v2194_v16 = vtrunc.f32 %v864_v31 }
 0x1fa   : > { %v1560_v20 = vadd.f32 %v1559_v29, %v1558_v14  ;;  %v1951_v36 = vsel %vm949_vm10, 1.0, %v2299_v2  ;;  %v1952_v38 = vsel %vm950_vm11, 1.0, %v2299_v2 }
 0x1fb   : > { %v2193_v37 = vcvt.f32.s32 %v2192_v33  ;;  %v1561_v40 = vsel %vm689_vm1, %v1951_v36, 0.0  ;;  %v2195_v22 = vcvt.f32.s32 %v2194_v16  ;;  %2142 = vmatmul.mubr.msk.f32.gmra.mxu1 %vm689_vm1, %v1951_v36  ;;  %v1563_v39 = vsel %vm689_vm1, %v1952_v38, 0.0 }
 0x1fc   : > { %v1562_v26 = vadd.f32 %v1561_v40, %v1560_v20  ;;  %v867_v42 = vpop.xlane.xlu1 %866  ;;  %2144 = vmatprep.mubr.msk.f32.mxu1 %vm689_vm1, %v1952_v38  ;;  %v870_v43 = vpop.xlane.xlu0 %869 }
 0x1fd   : > { %1463 = vst.msk [vmem:[%s2696_s12 + $0x18] sm:$0xff] %vm1459_vm7, %v2193_v37  ;;  %1464 = vst.msk [vmem:[%s2696_s12 + $0x20] sm:$0xff] %vm1459_vm7, %v2195_v22  ;;  %vm951_vm12 = vcmp.eq.f32.partialorder %v2593_v24, %v867_v42  ;;  %v2196_v46 = vtrunc.f32 %v867_v42  ;;  %vm952_vm13 = vcmp.eq.f32.partialorder %v2593_v24, %v870_v43  ;;  %v2198_v28 = vtrunc.f32 %v870_v43 }
 0x1fe   : > { %v1564_v32 = vadd.f32 %v1563_v39, %v1562_v26  ;;  %v1953_v47 = vsel %vm951_vm12, 1.0, %v2299_v2  ;;  %v1954_v49 = vsel %vm952_vm13, 1.0, %v2299_v2 }
 0x1ff   : > { %v2197_v44 = vcvt.f32.s32 %v2196_v46  ;;  %v1565_v48 = vsel %vm689_vm1, %v1953_v47, 0.0  ;;  %v2199_v34 = vcvt.f32.s32 %v2198_v28  ;;  %2145 = vmatmul.mubr.msk.f32.gmra.mxu1 %vm689_vm1, %v1953_v47  ;;  %v1567_v52 = vsel %vm689_vm1, %v1954_v49, 0.0 }
 0x200   : > { %v1566_v41 = vadd.f32 %v1565_v48, %v1564_v32  ;;  %v873_v55 = vpop.xlane.xlu1 %872  ;;  %2147 = vmatprep.mubr.msk.f32.mxu1 %vm689_vm1, %v1954_v49  ;;  %v876_v57 = vpop.xlane.xlu0 %875 }
 0x201   : > { %1465 = vst.msk [vmem:[%s2696_s12 + $0x28] sm:$0xff] %vm1459_vm7, %v2197_v44  ;;  %1466 = vst.msk [vmem:[%s2696_s12 + $0x30] sm:$0xff] %vm1459_vm7, %v2199_v34  ;;  %vm953_vm14 = vcmp.eq.f32.partialorder %v2593_v24, %v873_v55  ;;  %v2200_v58 = vtrunc.f32 %v873_v55  ;;  %vm954_vm15 = vcmp.eq.f32.partialorder %v2593_v24, %v876_v57  ;;  %v2202_v45 = vtrunc.f32 %v876_v57 }
 0x202   : > { %v1568_v51 = vadd.f32 %v1567_v52, %v1566_v41  ;;  %v1955_v50 = vsel %vm953_vm14, 1.0, %v2299_v2  ;;  %v1956_v54 = vsel %vm954_vm15, 1.0, %v2299_v2 }
 0x203   : > { %v2201_v61 = vcvt.f32.s32 %v2200_v58  ;;  %v1569_v0 = vsel %vm689_vm1, %v1955_v50, 0.0  ;;  %v2203_v53 = vcvt.f32.s32 %v2202_v45  ;;  %2148 = vmatmul.mubr.msk.f32.gmra.mxu1 %vm689_vm1, %v1955_v50  ;;  %v1571_v1 = vsel %vm689_vm1, %v1956_v54, 0.0 }
 0x204   : > { %v1570_v59 = vadd.f32 %v1569_v0, %v1568_v51  ;;  %v879_v3 = vpop.xlane.xlu1 %878  ;;  %2150 = vmatprep.mubr.msk.f32.mxu1 %vm689_vm1, %v1956_v54  ;;  %v882_v56 = vpop.xlane.xlu0 %881 }
 0x205   : > { %1467 = vst.msk [vmem:[%s2696_s12 + $0x38] sm:$0xff] %vm1459_vm7, %v2201_v61  ;;  %1468 = vst.msk [vmem:[%s2696_s12 + $0x40] sm:$0xff] %vm1459_vm7, %v2203_v53  ;;  %vm955_vm2 = vcmp.eq.f32.partialorder %v2593_v24, %v879_v3  ;;  %v2204_v60 = vtrunc.f32 %v879_v3  ;;  %vm956_vm3 = vcmp.eq.f32.partialorder %v2593_v24, %v882_v56  ;;  %v2206_v63 = vtrunc.f32 %v882_v56 }
 0x206   : > { %v1572_v5 = vadd.f32 %v1571_v1, %v1570_v59  ;;  %v1957_v6 = vsel %vm955_vm2, 1.0, %v2299_v2  ;;  %v1958_v9 = vsel %vm956_vm3, 1.0, %v2299_v2 }
 0x207   : > { %v2205_v11 = vcvt.f32.s32 %v2204_v60  ;;  %v1573_v12 = vsel %vm689_vm1, %v1957_v6, 0.0  ;;  %v2207_v7 = vcvt.f32.s32 %v2206_v63  ;;  %2151 = vmatmul.mubr.msk.f32.gmra.mxu1 %vm689_vm1, %v1957_v6  ;;  %v1575_v13 = vsel %vm689_vm1, %v1958_v9, 0.0 }
 0x208   : > { %v1574_v62 = vadd.f32 %v1573_v12, %v1572_v5  ;;  %v885_v17 = vpop.xlane.xlu1 %884  ;;  %2153 = vmatprep.mubr.msk.f32.mxu1 %vm689_vm1, %v1958_v9  ;;  %v888_v15 = vpop.xlane.xlu0 %887 }
 0x209   : > { %1469 = vst.msk [vmem:[%s2696_s12 + $0x48] sm:$0xff] %vm1459_vm7, %v2205_v11  ;;  %1470 = vst.msk [vmem:[%s2696_s12 + $0x50] sm:$0xff] %vm1459_vm7, %v2207_v7  ;;  %vm957_vm4 = vcmp.eq.f32.partialorder %v2593_v24, %v885_v17  ;;  %v2208_v18 = vtrunc.f32 %v885_v17  ;;  %vm958_vm5 = vcmp.eq.f32.partialorder %v2593_v24, %v888_v15  ;;  %v2210_v19 = vtrunc.f32 %v888_v15 }
 0x20a   : > { %v1576_v21 = vadd.f32 %v1575_v13, %v1574_v62  ;;  %v1959_v4 = vsel %vm957_vm4, 1.0, %v2299_v2  ;;  %v1960_v8 = vsel %vm958_vm5, 1.0, %v2299_v2 }
 0x20b   : > { %v2209_v23 = vcvt.f32.s32 %v2208_v18  ;;  %v1577_v25 = vsel %vm689_vm1, %v1959_v4, 0.0  ;;  %v2211_v35 = vcvt.f32.s32 %v2210_v19  ;;  %2154 = vmatmul.mubr.msk.f32.gmra.mxu1 %vm689_vm1, %v1959_v4  ;;  %v1579_v10 = vsel %vm689_vm1, %v1960_v8, 0.0 }
 0x20c   : > { %v1578_v27 = vadd.f32 %v1577_v25, %v1576_v21  ;;  %v891_v14 = vpop.xlane.xlu1 %890  ;;  %2156 = vmatprep.mubr.msk.f32.mxu1 %vm689_vm1, %v1960_v8  ;;  %v894_v29 = vpop.xlane.xlu0 %893 }
 0x20d   : > { %1471 = vst.msk [vmem:[%s2696_s12 + $0x58] sm:$0xff] %vm1459_vm7, %v2209_v23  ;;  %1472 = vst.msk [vmem:[%s2696_s12 + $0x60] sm:$0xff] %vm1459_vm7, %v2211_v35  ;;  %vm959_vm6 = vcmp.eq.f32.partialorder %v2593_v24, %v891_v14  ;;  %v2212_v30 = vtrunc.f32 %v891_v14  ;;  %vm960_vm8 = vcmp.eq.f32.partialorder %v2593_v24, %v894_v29  ;;  %v2214_v31 = vtrunc.f32 %v894_v29 }
 0x20e   : > { %v1580_v33 = vadd.f32 %v1579_v10, %v1578_v27  ;;  %v1961_v16 = vsel %vm959_vm6, 1.0, %v2299_v2  ;;  %v1962_v20 = vsel %vm960_vm8, 1.0, %v2299_v2 }
 0x20f   : > { %v2213_v36 = vcvt.f32.s32 %v2212_v30  ;;  %v1581_v38 = vsel %vm689_vm1, %v1961_v16, 0.0  ;;  %v2215_v37 = vcvt.f32.s32 %v2214_v31  ;;  %2157 = vmatmul.mubr.msk.f32.gmra.mxu1 %vm689_vm1, %v1961_v16  ;;  %v1583_v22 = vsel %vm689_vm1, %v1962_v20, 0.0 }
 0x210   : > { %v1582_v40 = vadd.f32 %v1581_v38, %v1580_v33  ;;  %v897_v26 = vpop.xlane.xlu1 %896  ;;  %2159 = vmatprep.mubr.msk.f32.mxu1 %vm689_vm1, %v1962_v20  ;;  %v900_v39 = vpop.xlane.xlu0 %899 }
 0x211   : > { %1473 = vst.msk [vmem:[%s2696_s12 + $0x68] sm:$0xff] %vm1459_vm7, %v2213_v36  ;;  %1474 = vst.msk [vmem:[%s2696_s12 + $0x70] sm:$0xff] %vm1459_vm7, %v2215_v37  ;;  %vm961_vm9 = vcmp.eq.f32.partialorder %v2593_v24, %v897_v26  ;;  %v2216_v42 = vtrunc.f32 %v897_v26  ;;  %vm962_vm10 = vcmp.eq.f32.partialorder %v2593_v24, %v900_v39  ;;  %v2218_v43 = vtrunc.f32 %v900_v39 }
 0x212   : > { %v1584_v46 = vadd.f32 %v1583_v22, %v1582_v40  ;;  %v1963_v28 = vsel %vm961_vm9, 1.0, %v2299_v2  ;;  %v1964_v32 = vsel %vm962_vm10, 1.0, %v2299_v2 }
 0x213   : > { %v2217_v47 = vcvt.f32.s32 %v2216_v42  ;;  %v1585_v49 = vsel %vm689_vm1, %v1963_v28, 0.0  ;;  %v2219_v44 = vcvt.f32.s32 %v2218_v43  ;;  %2160 = vmatmul.mubr.msk.f32.gmra.mxu1 %vm689_vm1, %v1963_v28  ;;  %v1587_v34 = vsel %vm689_vm1, %v1964_v32, 0.0 }
 0x214   : > { %v1586_v48 = vadd.f32 %v1585_v49, %v1584_v46  ;;  %v903_v41 = vpop.xlane.xlu1 %902  ;;  %2162 = vmatprep.mubr.msk.f32.mxu1 %vm689_vm1, %v1964_v32  ;;  %v906_v52 = vpop.xlane.xlu0 %905 }
 0x215   : > { %1475 = vst.msk [vmem:[%s2696_s12 + $0x78] sm:$0xff] %vm1459_vm7, %v2217_v47  ;;  %1476 = vst.msk [vmem:[%s2696_s12 + $0x80] sm:$0xff] %vm1459_vm7, %v2219_v44  ;;  %vm963_vm11 = vcmp.eq.f32.partialorder %v2593_v24, %v903_v41  ;;  %v2220_v55 = vtrunc.f32 %v903_v41  ;;  %vm964_vm12 = vcmp.eq.f32.partialorder %v2593_v24, %v906_v52  ;;  %v2222_v57 = vtrunc.f32 %v906_v52 }
 0x216   : > { %v1588_v58 = vadd.f32 %v1587_v34, %v1586_v48  ;;  %v1965_v45 = vsel %vm963_vm11, 1.0, %v2299_v2  ;;  %v1966_v51 = vsel %vm964_vm12, 1.0, %v2299_v2 }
 0x217   : > { %v2221_v50 = vcvt.f32.s32 %v2220_v55  ;;  %v1589_v54 = vsel %vm689_vm1, %v1965_v45, 0.0  ;;  %v2223_v61 = vcvt.f32.s32 %v2222_v57  ;;  %2163 = vmatmul.mubr.msk.f32.gmra.mxu1 %vm689_vm1, %v1965_v45  ;;  %v1591_v53 = vsel %vm689_vm1, %v1966_v51, 0.0 }
 0x218   : > { %v1590_v0 = vadd.f32 %v1589_v54, %v1588_v58  ;;  %v909_v59 = vpop.xlane.xlu1 %908  ;;  %2165 = vmatprep.mubr.msk.f32.mxu1 %vm689_vm1, %v1966_v51  ;;  %v912_v1 = vpop.xlane.xlu0 %911 }
 0x219   : > { %1477 = vst.msk [vmem:[%s2696_s12 + $0x88] sm:$0xff] %vm1459_vm7, %v2221_v50  ;;  %1478 = vst.msk [vmem:[%s2696_s12 + $0x90] sm:$0xff] %vm1459_vm7, %v2223_v61  ;;  %vm965_vm13 = vcmp.eq.f32.partialorder %v2593_v24, %v909_v59  ;;  %v2224_v3 = vtrunc.f32 %v909_v59  ;;  %vm966_vm14 = vcmp.eq.f32.partialorder %v2593_v24, %v912_v1  ;;  %v2226_v56 = vtrunc.f32 %v912_v1 }
 0x21a   : > { %v1592_v60 = vadd.f32 %v1591_v53, %v1590_v0  ;;  %v1967_v63 = vsel %vm965_vm13, 1.0, %v2299_v2  ;;  %v1968_v5 = vsel %vm966_vm14, 1.0, %v2299_v2  ;;  %vm1625_vm13 = vcmask 122880  }
 0x21b   : > { %v2225_v6 = vcvt.f32.s32 %v2224_v3  ;;  %v1593_v9 = vsel %vm689_vm1, %v1967_v63, 0.0  ;;  %v2227_v11 = vcvt.f32.s32 %v2226_v56  ;;  %2166 = vmatmul.mubr.msk.f32.gmra.mxu1 %vm689_vm1, %v1967_v63  ;;  %v1595_v7 = vsel %vm689_vm1, %v1968_v5, 0.0 }
 0x21c   : > { %v1594_v12 = vadd.f32 %v1593_v9, %v1592_v60  ;;  %v915_v62 = vpop.xlane.xlu1 %914  ;;  %2168 = vmatprep.mubr.msk.f32.mxu1 %vm689_vm1, %v1968_v5  ;;  %v918_v13 = vpop.xlane.xlu0 %917 }
 0x21d   : > { %1479 = vst.msk [vmem:[%s2696_s12 + $0x98] sm:$0xff] %vm1459_vm7, %v2225_v6  ;;  %1480 = vst.msk [vmem:[%s2696_s12 + $0xa0] sm:$0xff] %vm1459_vm7, %v2227_v11  ;;  %vm967_vm15 = vcmp.eq.f32.partialorder %v2593_v24, %v915_v62  ;;  %v2228_v17 = vtrunc.f32 %v915_v62  ;;  %vm968_vm2 = vcmp.eq.f32.partialorder %v2593_v24, %v918_v13  ;;  %v2230_v15 = vtrunc.f32 %v918_v13 }
 0x21e   : > { %v1596_v18 = vadd.f32 %v1595_v7, %v1594_v12  ;;  %v1969_v19 = vsel %vm967_vm15, 1.0, %v2299_v2  ;;  %v1970_v21 = vsel %vm968_vm2, 1.0, %v2299_v2 }
 0x21f   : > { %v2229_v4 = vcvt.f32.s32 %v2228_v17  ;;  %v1597_v8 = vsel %vm689_vm1, %v1969_v19, 0.0  ;;  %v2231_v23 = vcvt.f32.s32 %v2230_v15  ;;  %2169 = vmatmul.mubr.msk.f32.gmra.mxu1 %vm689_vm1, %v1969_v19  ;;  %v1599_v35 = vsel %vm689_vm1, %v1970_v21, 0.0 }
 0x220   : > { %v1598_v25 = vadd.f32 %v1597_v8, %v1596_v18  ;;  %v921_v27 = vpop.xlane.xlu1 %920  ;;  %2171 = vmatprep.mubr.msk.f32.mxu1 %vm689_vm1, %v1970_v21  ;;  %v924_v10 = vpop.xlane.xlu0 %923 }
 0x221   : > { %1481 = vst.msk [vmem:[%s2696_s12 + $0xa8] sm:$0xff] %vm1459_vm7, %v2229_v4  ;;  %1482 = vst.msk [vmem:[%s2696_s12 + $0xb0] sm:$0xff] %vm1459_vm7, %v2231_v23  ;;  %vm969_vm3 = vcmp.eq.f32.partialorder %v2593_v24, %v921_v27  ;;  %v2232_v14 = vtrunc.f32 %v921_v27  ;;  %vm970_vm4 = vcmp.eq.f32.partialorder %v2593_v24, %v924_v10  ;;  %v2234_v29 = vtrunc.f32 %v924_v10  ;;  %v2259_v27 = vld [vmem:[%s2362_s7 + $0x8] sm:$0xff] }
 0x222   : > { %v1600_v30 = vadd.f32 %v1599_v35, %v1598_v25  ;;  %v1971_v31 = vsel %vm969_vm3, 1.0, %v2299_v2  ;;  %v1972_v33 = vsel %vm970_vm4, 1.0, %v2299_v2 }
 0x223   : > { %v2233_v16 = vcvt.f32.s32 %v2232_v14  ;;  %v1601_v20 = vsel %vm689_vm1, %v1971_v31, 0.0  ;;  %v2235_v36 = vcvt.f32.s32 %v2234_v29  ;;  %2172 = vmatmul.mubr.msk.f32.gmra.mxu1 %vm689_vm1, %v1971_v31  ;;  %v1603_v37 = vsel %vm689_vm1, %v1972_v33, 0.0 }
 0x224   : > { %v1602_v38 = vadd.f32 %v1601_v20, %v1600_v30  ;;  %v927_v40 = vpop.xlane.xlu1 %926  ;;  %2174 = vmatprep.mubr.msk.f32.mxu1 %vm689_vm1, %v1972_v33  ;;  %v930_v22 = vpop.xlane.xlu0 %929  ;;  %v2260_v30 = vld [vmem:[%s2362_s7] sm:$0xff] }
 0x225   : > { %1483 = vst.msk [vmem:[%s2696_s12 + $0xb8] sm:$0xff] %vm1459_vm7, %v2233_v16  ;;  %1484 = vst.msk [vmem:[%s2696_s12 + $0xc0] sm:$0xff] %vm1459_vm7, %v2235_v36  ;;  %vm971_vm5 = vcmp.eq.f32.partialorder %v2593_v24, %v927_v40  ;;  %v2236_v26 = vtrunc.f32 %v927_v40  ;;  %vm972_vm6 = vcmp.eq.f32.partialorder %v2593_v24, %v930_v22  ;;  %v2238_v39 = vtrunc.f32 %v930_v22  ;;  %v2261_v36 = vld [vmem:[%s2362_s7 + $0x18] sm:$0xff] }
 0x226   : > { %v1604_v42 = vadd.f32 %v1603_v37, %v1602_v38  ;;  %v1973_v43 = vsel %vm971_vm5, 1.0, %v2299_v2  ;;  %v1974_v46 = vsel %vm972_vm6, 1.0, %v2299_v2 }
 0x227   : > { %v2237_v28 = vcvt.f32.s32 %v2236_v26  ;;  %v1605_v32 = vsel %vm689_vm1, %v1973_v43, 0.0  ;;  %v2239_v47 = vcvt.f32.s32 %v2238_v39  ;;  %2175 = vmatmul.mubr.msk.f32.gmra.mxu1 %vm689_vm1, %v1973_v43  ;;  %v1607_v44 = vsel %vm689_vm1, %v1974_v46, 0.0  ;;  %v2262_v39 = vld [vmem:[%s2362_s7 + $0x10] sm:$0xff] }
 0x228   : > { %v1606_v49 = vadd.f32 %v1605_v32, %v1604_v42  ;;  %v933_v48 = vpop.xlane.xlu1 %932  ;;  %2177 = vmatprep.mubr.msk.f32.mxu1 %vm689_vm1, %v1974_v46  ;;  %v936_v34 = vpop.xlane.xlu0 %935 }
 0x229   : > { %1485 = vst.msk [vmem:[%s2696_s12 + $0xc8] sm:$0xff] %vm1459_vm7, %v2237_v28  ;;  %1486 = vst.msk [vmem:[%s2696_s12 + $0xd0] sm:$0xff] %vm1459_vm7, %v2239_v47  ;;  %vm973_vm8 = vcmp.eq.f32.partialorder %v2593_v24, %v933_v48  ;;  %v2240_v41 = vtrunc.f32 %v933_v48  ;;  %vm974_vm9 = vcmp.eq.f32.partialorder %v2593_v24, %v936_v34  ;;  %v2242_v52 = vtrunc.f32 %v936_v34  ;;  %v2263_v47 = vld [vmem:[%s2362_s7 + $0x28] sm:$0xff] }
 0x22a   : > { %v1608_v55 = vadd.f32 %v1607_v44, %v1606_v49  ;;  %v1975_v57 = vsel %vm973_vm8, 1.0, %v2299_v2  ;;  %v1976_v58 = vsel %vm974_vm9, 1.0, %v2299_v2 }
 0x22b   : > { %v2241_v45 = vcvt.f32.s32 %v2240_v41  ;;  %v1609_v51 = vsel %vm689_vm1, %v1975_v57, 0.0  ;;  %v2243_v50 = vcvt.f32.s32 %v2242_v52  ;;  %2178 = vmatmul.mubr.msk.f32.gmra.mxu1 %vm689_vm1, %v1975_v57  ;;  %v1611_v61 = vsel %vm689_vm1, %v1976_v58, 0.0  ;;  %v2264_v52 = vld [vmem:[%s2362_s7 + $0x20] sm:$0xff] }
 0x22c   : > { %v1610_v54 = vadd.f32 %v1609_v51, %v1608_v55  ;;  %v939_v0 = vpop.xlane.xlu1 %938  ;;  %2180 = vmatprep.mubr.msk.f32.mxu1 %vm689_vm1, %v1976_v58  ;;  %v942_v53 = vpop.xlane.xlu0 %941 }
 0x22d   : > { %1487 = vst.msk [vmem:[%s2696_s12 + $0xd8] sm:$0xff] %vm1459_vm7, %v2241_v45  ;;  %1488 = vst.msk [vmem:[%s2696_s12 + $0xe0] sm:$0xff] %vm1459_vm7, %v2243_v50  ;;  %vm975_vm10 = vcmp.eq.f32.partialorder %v2593_v24, %v939_v0  ;;  %v2244_v59 = vtrunc.f32 %v939_v0  ;;  %vm976_vm11 = vcmp.eq.f32.partialorder %v2593_v24, %v942_v53  ;;  %v2246_v1 = vtrunc.f32 %v942_v53  ;;  %v2265_v50 = vld [vmem:[%s2362_s7 + $0x38] sm:$0xff] }
 0x22e   : > { %v1612_v3 = vadd.f32 %v1611_v61, %v1610_v54  ;;  %v1977_v56 = vsel %vm975_vm10, 1.0, %v2299_v2  ;;  %v1978_v60 = vsel %vm976_vm11, 1.0, %v2299_v2 }
 0x22f   : > { %v2245_v63 = vcvt.f32.s32 %v2244_v59  ;;  %v1613_v5 = vsel %vm689_vm1, %v1977_v56, 0.0  ;;  %v2247_v6 = vcvt.f32.s32 %v2246_v1  ;;  %2181 = vmatmul.mubr.msk.f32.gmra.mxu1 %vm689_vm1, %v1977_v56  ;;  %v1615_v12 = vsel %vm689_vm1, %v1978_v60, 0.0  ;;  %v2266_v1 = vld [vmem:[%s2362_s7 + $0x30] sm:$0xff] }
 0x230   : > { %v1614_v9 = vadd.f32 %v1613_v5, %v1612_v3  ;;  %v945_v11 = vpop.xlane.xlu1 %944  ;;  %2183 = vmatprep.mubr.msk.f32.mxu1 %vm689_vm1, %v1978_v60 }
 0x231   : > { %1489 = vst.msk [vmem:[%s2696_s12 + $0xe8] sm:$0xff] %vm1459_vm7, %v2245_v63  ;;  %1490 = vst.msk [vmem:[%s2696_s12 + $0xf0] sm:$0xff] %vm1459_vm7, %v2247_v6  ;;  %vm977_vm12 = vcmp.eq.f32.partialorder %v2593_v24, %v945_v11  ;;  %v2248_v7 = vtrunc.f32 %v945_v11  ;;  %v2267_v6 = vld [vmem:[%s2362_s7 + $0x48] sm:$0xff] }
 0x232   : > { %v1616_v62 = vadd.f32 %v1615_v12, %v1614_v9  ;;  %v1979_v13 = vsel %vm977_vm12, 1.0, %v2299_v2 }
 0x233   : > { %v2249_v17 = vcvt.f32.s32 %v2248_v7  ;;  %v1617_v15 = vsel %vm689_vm1, %v1979_v13, 0.0  ;;  %2184 = vmatmul.mubr.msk.f32.gmra.mxu1 %vm689_vm1, %v1979_v13  ;;  %v2268_v13 = vld [vmem:[%s2362_s7 + $0x40] sm:$0xff] }
 0x234   : > { %v1618_v18 = vadd.f32 %v1617_v15, %v1616_v62 }
 0x235   : > { %1491 = vst.msk [vmem:[%s2696_s12 + $0xf8] sm:$0xff] %vm1459_vm7, %v2249_v17 }
 0x236   : > { %v1619_v19 = vrot.slane %v1618_v18, 4 }
 0x238   : > { %v1620_v21 = vadd.f32 %v1619_v19, %v1618_v18 }
 0x23a   : > { %v1621_v4 = vrot.slane %v1620_v21, 2 }
 0x23c   : > { %v1622_v24 = vadd.f32 %v1621_v4, %v1620_v21  ;;  %v2269_v4 = vld [vmem:[%s2362_s7 + $0x58] sm:$0xff] }
 0x23e   : > { %v1623_v2 = vrot.slane %v1622_v24, 1 }
 0x240   : > { %v1624_v8 = vadd.f32 %v1623_v2, %v1622_v24 }
 0x242   : > { %1626 = vst.msk [vmem:[%s281_s15] sm:$0x1] %vm1625_vm13, %v1624_v8 }
 0x2b7   : > { %v2140_v23 = vpop.f32.mrf.mxu1 }
 0x2b8   : > { %v1364_v25 = vmul.f32 -0.5, %v2140_v23 }
 0x2b9   : > { %v1204_v35 = vpop.f32.mrf.mxu1 }
 0x2ba   : > { %1396 = vst.msk [vmem:[%s2901_s18 + $0x8] sm:$0xff] %vm320_vm0, %v1364_v25  ;;  %v1493_v10 = vsub.f32 %v1364_v25, %v2259_v27  ;;  %v1363_v14 = vmul.f32 -0.5, %v1204_v35  ;;  %v2270_v35 = vld [vmem:[%s2362_s7 + $0x50] sm:$0xff] }
 0x2bb   : > { %v2143_v29 = vpop.f32.mrf.mxu1 }
 0x2bc   : > { %1395 = vst.msk [vmem:[%s2901_s18] sm:$0xff] %vm320_vm0, %v1363_v14  ;;  %v1492_v31 = vsub.f32 %v1363_v14, %v2260_v30  ;;  %v1366_v33 = vmul.f32 -0.5, %v2143_v29  ;;  %v1525_v16 = vmul.f32 %v1493_v10, %v1493_v10 }
 0x2bd   : > { %v1214_v20 = vpop.f32.mrf.mxu1 }
 0x2be   : > { %1398 = vst.msk [vmem:[%s2901_s18 + $0x18] sm:$0xff] %vm320_vm0, %v1366_v33  ;;  %v1495_v38 = vsub.f32 %v1366_v33, %v2261_v36  ;;  %v1365_v37 = vmul.f32 -0.5, %v1214_v20  ;;  %v1630_v40 = vsel %vm320_vm0, %v1525_v16, 0.0  ;;  %v1524_v22 = vmul.f32 %v1492_v31, %v1492_v31  ;;  %v2271_v31 = vld [vmem:[%s2362_s7 + $0x68] sm:$0xff] }
 0x2bf   : > { %1631 = vadd.xlane.f32.xlu1 %v1630_v40  ;;  %v2146_v26 = vpop.f32.mrf.mxu1 }
 0x2c0   : > { %1397 = vst.msk [vmem:[%s2901_s18 + $0x10] sm:$0xff] %vm320_vm0, %v1365_v37  ;;  %v1494_v42 = vsub.f32 %v1365_v37, %v2262_v39  ;;  %v1368_v43 = vmul.f32 -0.5, %v2146_v26  ;;  %v1627_v46 = vsel %vm320_vm0, %v1524_v22, 0.0  ;;  %v1527_v28 = vmul.f32 %v1495_v38, %v1495_v38  ;;  %v2272_v37 = vld [vmem:[%s2362_s7 + $0x60] sm:$0xff] }
 0x2c1   : > { %1628 = vadd.xlane.f32.xlu0 %v1627_v46  ;;  %v1224_v32 = vpop.f32.mrf.mxu1 }
 0x2c2   : > { %1400 = vst.msk [vmem:[%s2901_s18 + $0x28] sm:$0xff] %vm320_vm0, %v1368_v43  ;;  %v1497_v49 = vsub.f32 %v1368_v43, %v2263_v47  ;;  %v1367_v44 = vmul.f32 -0.5, %v1224_v32  ;;  %v1636_v48 = vsel %vm320_vm0, %v1527_v28, 0.0  ;;  %v1526_v34 = vmul.f32 %v1494_v42, %v1494_v42  ;;  %v2273_v43 = vld [vmem:[%s2362_s7 + $0x78] sm:$0xff] }
 0x2c3   : > { %1637 = vadd.xlane.f32.xlu1 %v1636_v48  ;;  %v2149_v41 = vpop.f32.mrf.mxu1 }
 0x2c4   : > { %1399 = vst.msk [vmem:[%s2901_s18 + $0x20] sm:$0xff] %vm320_vm0, %v1367_v44  ;;  %v1496_v55 = vsub.f32 %v1367_v44, %v2264_v52  ;;  %v1370_v57 = vmul.f32 -0.5, %v2149_v41  ;;  %v1633_v58 = vsel %vm320_vm0, %v1526_v34, 0.0  ;;  %v1529_v45 = vmul.f32 %v1497_v49, %v1497_v49  ;;  %v2274_v44 = vld [vmem:[%s2362_s7 + $0x70] sm:$0xff] }
 0x2c5   : > { %1634 = vadd.xlane.f32.xlu0 %v1633_v58  ;;  %v1234_v51 = vpop.f32.mrf.mxu1 }
 0x2c6   : > { %1402 = vst.msk [vmem:[%s2901_s18 + $0x38] sm:$0xff] %vm320_vm0, %v1370_v57  ;;  %v1499_v54 = vsub.f32 %v1370_v57, %v2265_v50  ;;  %v1369_v61 = vmul.f32 -0.5, %v1234_v51  ;;  %v1642_v0 = vsel %vm320_vm0, %v1529_v45, 0.0  ;;  %v1528_v53 = vmul.f32 %v1496_v55, %v1496_v55  ;;  %v2275_v57 = vld [vmem:[%s2362_s7 + $0x88] sm:$0xff] }
 0x2c7   : > { %1643 = vadd.xlane.f32.xlu1 %v1642_v0  ;;  %v2152_v59 = vpop.f32.mrf.mxu1 }
 0x2c8   : > { %1401 = vst.msk [vmem:[%s2901_s18 + $0x30] sm:$0xff] %vm320_vm0, %v1369_v61  ;;  %v1498_v3 = vsub.f32 %v1369_v61, %v2266_v1  ;;  %v1372_v56 = vmul.f32 -0.5, %v2152_v59  ;;  %v1639_v60 = vsel %vm320_vm0, %v1528_v53, 0.0  ;;  %v1531_v63 = vmul.f32 %v1499_v54, %v1499_v54  ;;  %v2276_v61 = vld [vmem:[%s2362_s7 + $0x80] sm:$0xff] }
 0x2c9   : > { %1640 = vadd.xlane.f32.xlu0 %v1639_v60  ;;  %v1244_v5 = vpop.f32.mrf.mxu1 }
 0x2ca   : > { %1404 = vst.msk [vmem:[%s2901_s18 + $0x48] sm:$0xff] %vm320_vm0, %v1372_v56  ;;  %v1501_v9 = vsub.f32 %v1372_v56, %v2267_v6  ;;  %v1371_v11 = vmul.f32 -0.5, %v1244_v5  ;;  %v1648_v12 = vsel %vm320_vm0, %v1531_v63, 0.0  ;;  %v1530_v7 = vmul.f32 %v1498_v3, %v1498_v3  ;;  %v2277_v56 = vld [vmem:[%s2362_s7 + $0x98] sm:$0xff] }
 0x2cb   : > { %1649 = vadd.xlane.f32.xlu1 %v1648_v12  ;;  %v2155_v62 = vpop.f32.mrf.mxu1 }
 0x2cc   : > { %1403 = vst.msk [vmem:[%s2901_s18 + $0x40] sm:$0xff] %vm320_vm0, %v1371_v11  ;;  %v1500_v17 = vsub.f32 %v1371_v11, %v2268_v13  ;;  %v1374_v15 = vmul.f32 -0.5, %v2155_v62  ;;  %v1645_v18 = vsel %vm320_vm0, %v1530_v7, 0.0  ;;  %v1533_v19 = vmul.f32 %v1501_v9, %v1501_v9  ;;  %v2278_v11 = vld [vmem:[%s2362_s7 + $0x90] sm:$0xff] }
 0x2cd   : > { %1646 = vadd.xlane.f32.xlu0 %v1645_v18  ;;  %v1254_v21 = vpop.f32.mrf.mxu1 }
 0x2ce   : > { %1406 = vst.msk [vmem:[%s2901_s18 + $0x58] sm:$0xff] %vm320_vm0, %v1374_v15  ;;  %v1503_v24 = vsub.f32 %v1374_v15, %v2269_v4  ;;  %v1373_v2 = vmul.f32 -0.5, %v1254_v21  ;;  %v1654_v8 = vsel %vm320_vm0, %v1533_v19, 0.0  ;;  %v1532_v23 = vmul.f32 %v1500_v17, %v1500_v17  ;;  %v2279_v15 = vld [vmem:[%s2362_s7 + $0xa8] sm:$0xff] }
 0x2cf   : > { %1655 = vadd.xlane.f32.xlu1 %v1654_v8  ;;  %v2158_v25 = vpop.f32.mrf.mxu1 }
 0x2d0   : > { %1405 = vst.msk [vmem:[%s2901_s18 + $0x50] sm:$0xff] %vm320_vm0, %v1373_v2  ;;  %v1502_v27 = vsub.f32 %v1373_v2, %v2270_v35  ;;  %v1376_v10 = vmul.f32 -0.5, %v2158_v25  ;;  %v1651_v14 = vsel %vm320_vm0, %v1532_v23, 0.0  ;;  %v1535_v29 = vmul.f32 %v1503_v24, %v1503_v24  ;;  %v2280_v2 = vld [vmem:[%s2362_s7 + $0xa0] sm:$0xff] }
 0x2d1   : > { %1652 = vadd.xlane.f32.xlu0 %v1651_v14  ;;  %v1264_v30 = vpop.f32.mrf.mxu1 }
 0x2d2   : > { %1408 = vst.msk [vmem:[%s2901_s18 + $0x68] sm:$0xff] %vm320_vm0, %v1376_v10  ;;  %v1505_v33 = vsub.f32 %v1376_v10, %v2271_v31  ;;  %v1375_v16 = vmul.f32 -0.5, %v1264_v30  ;;  %v1660_v20 = vsel %vm320_vm0, %v1535_v29, 0.0  ;;  %v1534_v36 = vmul.f32 %v1502_v27, %v1502_v27  ;;  %v2281_v10 = vld [vmem:[%s2362_s7 + $0xb8] sm:$0xff] }
 0x2d3   : > { %1661 = vadd.xlane.f32.xlu1 %v1660_v20  ;;  %v2161_v38 = vpop.f32.mrf.mxu1 }
 0x2d4   : > { %1407 = vst.msk [vmem:[%s2901_s18 + $0x60] sm:$0xff] %vm320_vm0, %v1375_v16  ;;  %v1504_v40 = vsub.f32 %v1375_v16, %v2272_v37  ;;  %v1378_v22 = vmul.f32 -0.5, %v2161_v38  ;;  %v1657_v26 = vsel %vm320_vm0, %v1534_v36, 0.0  ;;  %v1537_v39 = vmul.f32 %v1505_v33, %v1505_v33  ;;  %v2282_v16 = vld [vmem:[%s2362_s7 + $0xb0] sm:$0xff] }
 0x2d5   : > { %1658 = vadd.xlane.f32.xlu0 %v1657_v26  ;;  %v1274_v42 = vpop.f32.mrf.mxu1 }
 0x2d6   : > { %1410 = vst.msk [vmem:[%s2901_s18 + $0x78] sm:$0xff] %vm320_vm0, %v1378_v22  ;;  %v1507_v46 = vsub.f32 %v1378_v22, %v2273_v43  ;;  %v1377_v28 = vmul.f32 -0.5, %v1274_v42  ;;  %v1666_v32 = vsel %vm320_vm0, %v1537_v39, 0.0  ;;  %v1536_v47 = vmul.f32 %v1504_v40, %v1504_v40  ;;  %v2283_v22 = vld [vmem:[%s2362_s7 + $0xc8] sm:$0xff] }
 0x2d7   : > { %1667 = vadd.xlane.f32.xlu1 %v1666_v32  ;;  %v2164_v49 = vpop.f32.mrf.mxu1 }
 0x2d8   : > { %1409 = vst.msk [vmem:[%s2901_s18 + $0x70] sm:$0xff] %vm320_vm0, %v1377_v28  ;;  %v1506_v48 = vsub.f32 %v1377_v28, %v2274_v44  ;;  %v1380_v34 = vmul.f32 -0.5, %v2164_v49  ;;  %v1663_v41 = vsel %vm320_vm0, %v1536_v47, 0.0  ;;  %v1539_v52 = vmul.f32 %v1507_v46, %v1507_v46  ;;  %v2284_v28 = vld [vmem:[%s2362_s7 + $0xc0] sm:$0xff] }
 0x2d9   : > { %1664 = vadd.xlane.f32.xlu0 %v1663_v41  ;;  %v1284_v55 = vpop.f32.mrf.mxu1 }
 0x2da   : > { %1412 = vst.msk [vmem:[%s2901_s18 + $0x88] sm:$0xff] %vm320_vm0, %v1380_v34  ;;  %v1509_v58 = vsub.f32 %v1380_v34, %v2275_v57  ;;  %v1379_v45 = vmul.f32 -0.5, %v1284_v55  ;;  %v1672_v51 = vsel %vm320_vm0, %v1539_v52, 0.0  ;;  %v1538_v50 = vmul.f32 %v1506_v48, %v1506_v48  ;;  %v2285_v34 = vld [vmem:[%s2362_s7 + $0xd8] sm:$0xff] }
 0x2db   : > { %1673 = vadd.xlane.f32.xlu1 %v1672_v51  ;;  %v2167_v54 = vpop.f32.mrf.mxu1 }
 0x2dc   : > { %1411 = vst.msk [vmem:[%s2901_s18 + $0x80] sm:$0xff] %vm320_vm0, %v1379_v45  ;;  %v1508_v0 = vsub.f32 %v1379_v45, %v2276_v61  ;;  %v1382_v53 = vmul.f32 -0.5, %v2167_v54  ;;  %v1669_v59 = vsel %vm320_vm0, %v1538_v50, 0.0  ;;  %v1541_v1 = vmul.f32 %v1509_v58, %v1509_v58  ;;  %v2286_v45 = vld [vmem:[%s2362_s7 + $0xd0] sm:$0xff] }
 0x2dd   : > { %1670 = vadd.xlane.f32.xlu0 %v1669_v59  ;;  %v1294_v3 = vpop.f32.mrf.mxu1 }
 0x2de   : > { %1414 = vst.msk [vmem:[%s2901_s18 + $0x98] sm:$0xff] %vm320_vm0, %v1382_v53  ;;  %v1511_v60 = vsub.f32 %v1382_v53, %v2277_v56  ;;  %v1381_v63 = vmul.f32 -0.5, %v1294_v3  ;;  %v1678_v5 = vsel %vm320_vm0, %v1541_v1, 0.0  ;;  %v1540_v6 = vmul.f32 %v1508_v0, %v1508_v0  ;;  %v2287_v53 = vld [vmem:[%s2362_s7 + $0xe8] sm:$0xff] }
 0x2df   : > { %1679 = vadd.xlane.f32.xlu1 %v1678_v5  ;;  %v2170_v9 = vpop.f32.mrf.mxu1 }
 0x2e0   : > { %1413 = vst.msk [vmem:[%s2901_s18 + $0x90] sm:$0xff] %vm320_vm0, %v1381_v63  ;;  %v1510_v12 = vsub.f32 %v1381_v63, %v2278_v11  ;;  %v1384_v7 = vmul.f32 -0.5, %v2170_v9  ;;  %v1675_v62 = vsel %vm320_vm0, %v1540_v6, 0.0  ;;  %v1543_v13 = vmul.f32 %v1511_v60, %v1511_v60  ;;  %v2288_v63 = vld [vmem:[%s2362_s7 + $0xe0] sm:$0xff] }
 0x2e1   : > { %1676 = vadd.xlane.f32.xlu0 %v1675_v62  ;;  %v1304_v17 = vpop.f32.mrf.mxu1 }
 0x2e2   : > { %1416 = vst.msk [vmem:[%s2901_s18 + $0xa8] sm:$0xff] %vm320_vm0, %v1384_v7  ;;  %v1513_v18 = vsub.f32 %v1384_v7, %v2279_v15  ;;  %v1383_v19 = vmul.f32 -0.5, %v1304_v17  ;;  %v1684_v21 = vsel %vm320_vm0, %v1543_v13, 0.0  ;;  %v1542_v4 = vmul.f32 %v1510_v12, %v1510_v12  ;;  %v2289_v7 = vld [vmem:[%s2362_s7 + $0xf8] sm:$0xff] }
 0x2e3   : > { %1685 = vadd.xlane.f32.xlu1 %v1684_v21  ;;  %v2173_v24 = vpop.f32.mrf.mxu1 }
 0x2e4   : > { %1415 = vst.msk [vmem:[%s2901_s18 + $0xa0] sm:$0xff] %vm320_vm0, %v1383_v19  ;;  %v1512_v8 = vsub.f32 %v1383_v19, %v2280_v2  ;;  %v1386_v23 = vmul.f32 -0.5, %v2173_v24  ;;  %v1681_v25 = vsel %vm320_vm0, %v1542_v4, 0.0  ;;  %v1545_v35 = vmul.f32 %v1513_v18, %v1513_v18  ;;  %v2290_v18 = vld [vmem:[%s2362_s7 + $0xf0] sm:$0xff] }
 0x2e5   : > { %1682 = vadd.xlane.f32.xlu0 %v1681_v25  ;;  %v1314_v27 = vpop.f32.mrf.mxu1 }
 0x2e6   : > { %1418 = vst.msk [vmem:[%s2901_s18 + $0xb8] sm:$0xff] %vm320_vm0, %v1386_v23  ;;  %v1515_v14 = vsub.f32 %v1386_v23, %v2281_v10  ;;  %v1385_v29 = vmul.f32 -0.5, %v1314_v27  ;;  %v1690_v30 = vsel %vm320_vm0, %v1545_v35, 0.0  ;;  %v1544_v31 = vmul.f32 %v1512_v8, %v1512_v8 }
 0x2e7   : > { %1691 = vadd.xlane.f32.xlu1 %v1690_v30  ;;  %v2176_v33 = vpop.f32.mrf.mxu1 }
 0x2e8   : > { %1417 = vst.msk [vmem:[%s2901_s18 + $0xb0] sm:$0xff] %vm320_vm0, %v1385_v29  ;;  %v1514_v20 = vsub.f32 %v1385_v29, %v2282_v16  ;;  %v1388_v36 = vmul.f32 -0.5, %v2176_v33  ;;  %v1687_v38 = vsel %vm320_vm0, %v1544_v31, 0.0  ;;  %v1547_v37 = vmul.f32 %v1515_v14, %v1515_v14 }
 0x2e9   : > { %1688 = vadd.xlane.f32.xlu0 %v1687_v38  ;;  %v1324_v40 = vpop.f32.mrf.mxu1 }
 0x2ea   : > { %1420 = vst.msk [vmem:[%s2901_s18 + $0xc8] sm:$0xff] %vm320_vm0, %v1388_v36  ;;  %v1517_v26 = vsub.f32 %v1388_v36, %v2283_v22  ;;  %v1387_v39 = vmul.f32 -0.5, %v1324_v40  ;;  %v1696_v42 = vsel %vm320_vm0, %v1547_v37, 0.0  ;;  %v1546_v43 = vmul.f32 %v1514_v20, %v1514_v20 }
 0x2eb   : > { %1697 = vadd.xlane.f32.xlu1 %v1696_v42  ;;  %v2179_v46 = vpop.f32.mrf.mxu1 }
 0x2ec   : > { %1419 = vst.msk [vmem:[%s2901_s18 + $0xc0] sm:$0xff] %vm320_vm0, %v1387_v39  ;;  %v1516_v32 = vsub.f32 %v1387_v39, %v2284_v28  ;;  %v1390_v47 = vmul.f32 -0.5, %v2179_v46  ;;  %v1693_v49 = vsel %vm320_vm0, %v1546_v43, 0.0  ;;  %v1549_v44 = vmul.f32 %v1517_v26, %v1517_v26 }
 0x2ed   : > { %1694 = vadd.xlane.f32.xlu0 %v1693_v49  ;;  %v1334_v48 = vpop.f32.mrf.mxu1 }
 0x2ee   : > { %1422 = vst.msk [vmem:[%s2901_s18 + $0xd8] sm:$0xff] %vm320_vm0, %v1390_v47  ;;  %v1519_v41 = vsub.f32 %v1390_v47, %v2285_v34  ;;  %v1389_v52 = vmul.f32 -0.5, %v1334_v48  ;;  %v1702_v55 = vsel %vm320_vm0, %v1549_v44, 0.0  ;;  %v1548_v57 = vmul.f32 %v1516_v32, %v1516_v32 }
 0x2ef   : > { %1703 = vadd.xlane.f32.xlu1 %v1702_v55  ;;  %v2182_v58 = vpop.f32.mrf.mxu1 }
 0x2f0   : > { %1421 = vst.msk [vmem:[%s2901_s18 + $0xd0] sm:$0xff] %vm320_vm0, %v1389_v52  ;;  %v1518_v51 = vsub.f32 %v1389_v52, %v2286_v45  ;;  %v1392_v50 = vmul.f32 -0.5, %v2182_v58  ;;  %v1699_v54 = vsel %vm320_vm0, %v1548_v57, 0.0  ;;  %v1551_v61 = vmul.f32 %v1519_v41, %v1519_v41 }
 0x2f1   : > { %1700 = vadd.xlane.f32.xlu0 %v1699_v54  ;;  %v1344_v0 = vpop.f32.mrf.mxu1 }
 0x2f2   : > { %1424 = vst.msk [vmem:[%s2901_s18 + $0xe8] sm:$0xff] %vm320_vm0, %v1392_v50  ;;  %v1521_v59 = vsub.f32 %v1392_v50, %v2287_v53  ;;  %v1391_v1 = vmul.f32 -0.5, %v1344_v0  ;;  %v1708_v3 = vsel %vm320_vm0, %v1551_v61, 0.0  ;;  %v1550_v56 = vmul.f32 %v1518_v51, %v1518_v51 }
 0x2f3   : > { %1709 = vadd.xlane.f32.xlu1 %v1708_v3  ;;  %v2185_v60 = vpop.f32.mrf.mxu1 }
 0x2f4   : > { %1423 = vst.msk [vmem:[%s2901_s18 + $0xe0] sm:$0xff] %vm320_vm0, %v1391_v1  ;;  %v1520_v5 = vsub.f32 %v1391_v1, %v2288_v63  ;;  %v1394_v6 = vmul.f32 -0.5, %v2185_v60  ;;  %v1705_v9 = vsel %vm320_vm0, %v1550_v56, 0.0  ;;  %v1553_v11 = vmul.f32 %v1521_v59, %v1521_v59 }
 0x2f5   : > { %1706 = vadd.xlane.f32.xlu0 %v1705_v9  ;;  %v1354_v12 = vpop.f32.mrf.mxu1 }
 0x2f6   : > { %1426 = vst.msk [vmem:[%s2901_s18 + $0xf8] sm:$0xff] %vm320_vm0, %v1394_v6  ;;  %v1523_v62 = vsub.f32 %v1394_v6, %v2289_v7  ;;  %v1393_v13 = vmul.f32 -0.5, %v1354_v12  ;;  %v1714_v17 = vsel %vm320_vm0, %v1553_v11, 0.0  ;;  %v1552_v15 = vmul.f32 %v1520_v5, %v1520_v5 }
 0x2f7   : > { %1715 = vadd.xlane.f32.xlu1 %v1714_v17 }
 0x2f8   : > { %1425 = vst.msk [vmem:[%s2901_s18 + $0xf0] sm:$0xff] %vm320_vm0, %v1393_v13  ;;  %v1522_v19 = vsub.f32 %v1393_v13, %v2290_v18  ;;  %v1711_v21 = vsel %vm320_vm0, %v1552_v15, 0.0  ;;  %v1555_v4 = vmul.f32 %v1523_v62, %v1523_v62 }
 0x2f9   : > { %1712 = vadd.xlane.f32.xlu0 %v1711_v21 }
 0x2fa   : > { %v1554_v24 = vmul.f32 %v1522_v19, %v1522_v19  ;;  %v1720_v2 = vsel %vm320_vm0, %v1555_v4, 0.0 }
 0x2fb   : > { %1721 = vadd.xlane.f32.xlu1 %v1720_v2 }
 0x2fc   : > { %v1717_v8 = vsel %vm320_vm0, %v1554_v24, 0.0  ;;  %vm1760_vm0 = vcmask 0  }
 0x2fd   : > { %1718 = vadd.xlane.f32.xlu0 %v1717_v8 }
 0x348   : > { %v1632_v23 = vpop.xlane.xlu1 %1631 }
 0x34a   : > { %v1629_v25 = vpop.xlane.xlu0 %1628 }
 0x34b   : > { %v1723_v27 = vadd.f32 %v1632_v23, %v1629_v25 }
 0x34c   : > { %v1638_v35 = vpop.xlane.xlu1 %1637 }
 0x34e   : > { %v1635_v10 = vpop.xlane.xlu0 %1634 }
 0x34f   : > { %v1724_v14 = vadd.f32 %v1723_v27, %v1635_v10 }
 0x350   : > { %v1644_v29 = vpop.xlane.xlu1 %1643 }
 0x351   : > { %v1725_v30 = vadd.f32 %v1724_v14, %v1638_v35 }
 0x352   : > { %v1641_v31 = vpop.xlane.xlu0 %1640 }
 0x353   : > { %v1726_v33 = vadd.f32 %v1725_v30, %v1641_v31 }
 0x354   : > { %v1650_v16 = vpop.xlane.xlu1 %1649 }
 0x355   : > { %v1727_v20 = vadd.f32 %v1726_v33, %v1644_v29 }
 0x356   : > { %v1647_v36 = vpop.xlane.xlu0 %1646 }
 0x357   : > { %v1728_v38 = vadd.f32 %v1727_v20, %v1647_v36 }
 0x358   : > { %v1656_v37 = vpop.xlane.xlu1 %1655 }
 0x359   : > { %v1729_v40 = vadd.f32 %v1728_v38, %v1650_v16 }
 0x35a   : > { %v1653_v22 = vpop.xlane.xlu0 %1652 }
 0x35b   : > { %v1730_v26 = vadd.f32 %v1729_v40, %v1653_v22 }
 0x35c   : > { %v1662_v39 = vpop.xlane.xlu1 %1661 }
 0x35d   : > { %v1731_v42 = vadd.f32 %v1730_v26, %v1656_v37 }
 0x35e   : > { %v1659_v43 = vpop.xlane.xlu0 %1658 }
 0x35f   : > { %v1732_v46 = vadd.f32 %v1731_v42, %v1659_v43 }
 0x360   : > { %v1668_v28 = vpop.xlane.xlu1 %1667 }
 0x361   : > { %v1733_v32 = vadd.f32 %v1732_v46, %v1662_v39 }
 0x362   : > { %v1665_v47 = vpop.xlane.xlu0 %1664 }
 0x363   : > { %v1734_v49 = vadd.f32 %v1733_v32, %v1665_v47 }
 0x364   : > { %v1674_v44 = vpop.xlane.xlu1 %1673 }
 0x365   : > { %v1735_v48 = vadd.f32 %v1734_v49, %v1668_v28 }
 0x366   : > { %v1671_v34 = vpop.xlane.xlu0 %1670 }
 0x367   : > { %v1736_v41 = vadd.f32 %v1735_v48, %v1671_v34 }
 0x368   : > { %v1680_v52 = vpop.xlane.xlu1 %1679 }
 0x369   : > { %v1737_v55 = vadd.f32 %v1736_v41, %v1674_v44 }
 0x36a   : > { %v1677_v57 = vpop.xlane.xlu0 %1676 }
 0x36b   : > { %v1738_v58 = vadd.f32 %v1737_v55, %v1677_v57 }
 0x36c   : > { %v1686_v45 = vpop.xlane.xlu1 %1685 }
 0x36d   : > { %v1739_v51 = vadd.f32 %v1738_v58, %v1680_v52 }
 0x36e   : > { %v1683_v50 = vpop.xlane.xlu0 %1682 }
 0x36f   : > { %v1740_v54 = vadd.f32 %v1739_v51, %v1683_v50 }
 0x370   : > { %v1692_v61 = vpop.xlane.xlu1 %1691 }
 0x371   : > { %v1741_v0 = vadd.f32 %v1740_v54, %v1686_v45 }
 0x372   : > { %v1689_v53 = vpop.xlane.xlu0 %1688 }
 0x373   : > { %v1742_v59 = vadd.f32 %v1741_v0, %v1689_v53 }
 0x374   : > { %v1698_v1 = vpop.xlane.xlu1 %1697 }
 0x375   : > { %v1743_v3 = vadd.f32 %v1742_v59, %v1692_v61 }
 0x376   : > { %v1695_v56 = vpop.xlane.xlu0 %1694 }
 0x377   : > { %v1744_v60 = vadd.f32 %v1743_v3, %v1695_v56 }
 0x378   : > { %v1704_v63 = vpop.xlane.xlu1 %1703 }
 0x379   : > { %v1745_v5 = vadd.f32 %v1744_v60, %v1698_v1 }
 0x37a   : > { %v1701_v6 = vpop.xlane.xlu0 %1700 }
 0x37b   : > { %v1746_v9 = vadd.f32 %v1745_v5, %v1701_v6 }
 0x37c   : > { %v1710_v11 = vpop.xlane.xlu1 %1709 }
 0x37d   : > { %v1747_v12 = vadd.f32 %v1746_v9, %v1704_v63 }
 0x37e   : > { %v1707_v7 = vpop.xlane.xlu0 %1706 }
 0x37f   : > { %v1748_v62 = vadd.f32 %v1747_v12, %v1707_v7 }
 0x380   : > { %v1716_v17 = vpop.xlane.xlu1 %1715 }
 0x381   : > { %v1749_v13 = vadd.f32 %v1748_v62, %v1710_v11 }
 0x382   : > { %v1713_v15 = vpop.xlane.xlu0 %1712 }
 0x383   : > { %v1750_v18 = vadd.f32 %v1749_v13, %v1713_v15 }
 0x384   : > { %v1722_v24 = vpop.xlane.xlu1 %1721 }
 0x385   : > { %v1751_v19 = vadd.f32 %v1750_v18, %v1716_v17 }
 0x386   : > { %v1719_v21 = vpop.xlane.xlu0 %1718 }
 0x387   : > { %v1752_v4 = vadd.f32 %v1751_v19, %v1719_v21 }
 0x389   : > { %v1753_v2 = vadd.f32 %v1752_v4, %v1722_v24 }
 0x38b   : > { %v1754_v8 = vrot.slane %v1753_v2, 4 }
 0x38d   : > { %v1755_v23 = vadd.f32 %v1754_v8, %v1753_v2 }
 0x38f   : > { %v1756_v25 = vrot.slane %v1755_v23, 2 }
 0x391   : > { %v1757_v35 = vadd.f32 %v1756_v25, %v1755_v23 }
 0x393   : > { %v1758_v27 = vrot.slane %v1757_v35, 1 }
 0x395   : > { %v1759_v10 = vadd.f32 %v1758_v27, %v1757_v35 }
 0x397   : > { %1761 = vst.msk [vmem:[%s284_s23] sm:$0x1] %vm1760_vm0, %v1759_v10 }
 0x398 PF: > { %s17_s21 = sadd.s32 1, %s2297_s21  }
 0x399   : > { %p14_p5 = scmp.ge.s32.totalorder %s17_s21, 4  }
 0x39b   :  { %16 = sbr.rel (!%p14_p5) target bundleno = 1 (0x1), region = 98 }

</bundles_post_ra>
